<compile_context>
chip_gen: v7x
topology: tpu7x:2x2x1
jax: 0.10.0
libtpu: 0.0.40
codegen_flags: <defaults>
</compile_context>

<pallas_src>
import functools

import jax
import jax.numpy as jnp
from jax.experimental import pallas as pl
from jax.experimental.pallas import tpu as pltpu

LANE = 128


def _round_up(n, m):
    return ((n + m - 1) // m) * m


def _vmem_cap_bytes():
    try:
        return int(pltpu.get_tpu_info().vmem_capacity_bytes)
    except Exception:
        return 64 << 20  # conservative: v7x per-core VMEM


# ----------------------------------------------------------------------------
# Fused single-call kernel (whole problem VMEM-resident).
# ----------------------------------------------------------------------------
def _dagnn_fused_kernel(x_ref, w1_ref, b1_ref, w2_ref, b2_ref, a_hbm_ref,
                        o_ref, a_vmem, a_sem, *, hop, score_lane):
    # Kick off A's HBM->VMEM DMA first; the MLP below never touches A, so the
    # (largest) transfer is hidden behind the two matmuls.
    a_cp = pltpu.make_async_copy(a_hbm_ref, a_vmem, a_sem.at[0])
    a_cp.start()

    # linear1 + ReLU (weights pre-transposed to (in, out); f32 accumulation)
    h = jnp.dot(x_ref[...], w1_ref[...], preferred_element_type=jnp.float32)
    h = jnp.maximum(h + b1_ref[...], 0.0).astype(w2_ref.dtype)

    # linear2; lane `score_lane` holds <xk, s> (s folded into w2/b2 in wrapper)
    xk = jnp.dot(h, w2_ref[...], preferred_element_type=jnp.float32) + b2_ref[...]

    def gated(v):
        return jax.nn.sigmoid(v[:, score_lane:score_lane + 1]) * v

    acc = gated(xk)                         # k = 0 term

    a_cp.wait()
    a = a_vmem[...]

    def body(_, carry):
        xk, acc = carry
        xk = jnp.dot(a, xk.astype(a.dtype), preferred_element_type=jnp.float32)
        return xk, acc + gated(xk)

    _, acc = jax.lax.fori_loop(0, hop, body, (xk, acc), unroll=True)
    o_ref[...] = acc.astype(o_ref.dtype)


# ----------------------------------------------------------------------------
# Tiled path (used when A exceeds the VMEM budget): MLP kernel + per-hop kernel.
# ----------------------------------------------------------------------------
def _mlp_kernel(x_ref, w1_ref, b1_ref, w2_ref, b2_ref, xk_ref, acc_ref, *, score_lane):
    h = jnp.dot(x_ref[...], w1_ref[...], preferred_element_type=jnp.float32)
    h = jnp.maximum(h + b1_ref[...], 0.0).astype(w2_ref.dtype)
    xk = jnp.dot(h, w2_ref[...], preferred_element_type=jnp.float32) + b2_ref[...]
    xk_ref[...] = xk.astype(xk_ref.dtype)
    acc_ref[...] = jax.nn.sigmoid(xk[:, score_lane:score_lane + 1]) * xk


def _hop_kernel(a_ref, xk_ref, acc_ref, xk_out_ref, acc_out_ref, scr, *, score_lane):
    # grid = (rows, k); k is the reduction axis (last).
    k = pl.program_id(1)

    @pl.when(k == 0)
    def _():
        scr[...] = jnp.zeros_like(scr)

    scr[...] += jnp.dot(a_ref[...], xk_ref[...], preferred_element_type=jnp.float32)

    @pl.when(k == pl.num_programs(1) - 1)
    def _():
        v = scr[...]
        xk_out_ref[...] = v.astype(xk_out_ref.dtype)
        gate = jax.nn.sigmoid(v[:, score_lane:score_lane + 1])
        acc_out_ref[...] = acc_ref[...] + gate * v


# ----------------------------------------------------------------------------
# Wrapper
# ----------------------------------------------------------------------------
def dagnn_forward(x, A, params, *, hop, compute_dtype=jnp.bfloat16,
                  force_tiled=False, tm=128, tk=128):
    """DAGNN forward. x: (N, F_in) f32, A: (N, N) dense normalized adjacency."""
    W1, b1, W2, b2, s = params
    N, f_in = x.shape
    n_hid = W1.shape[0]          # torch nn.Linear layout: (out, in)
    n_out = W2.shape[0]

    f_in_p = _round_up(f_in, LANE)
    hid_p = _round_up(n_hid, LANE)
    out_p = _round_up(n_out + 1, LANE)      # +1: spare lane carries <xk, s>
    n_p = _round_up(N, LANE)
    score_lane = n_out
    cdt = compute_dtype
    itemsize = jnp.dtype(cdt).itemsize

    # Zero-pad to lane/sublane multiples and pre-transpose weights to (in, out).
    # Padded lanes / rows stay exactly zero through every stage.
    x_p = jnp.zeros((n_p, f_in_p), cdt).at[:N, :f_in].set(x.astype(cdt))
    a_p = jnp.zeros((n_p, n_p), cdt).at[:N, :N].set(A.astype(cdt))
    w1t = jnp.zeros((f_in_p, hid_p), cdt).at[:f_in, :n_hid].set(W1.T.astype(cdt))
    b1p = jnp.zeros((1, hid_p), jnp.float32).at[0, :n_hid].set(b1)
    # Fold s into linear2 so lane `n_out` of xk equals xk @ s (fold in f32, then cast).
    w2e = jnp.zeros((n_hid, out_p), jnp.float32).at[:, :n_out].set(W2.T)
    w2e = w2e.at[:, score_lane].set(W2.T @ s[:, 0])
    w2t = jnp.zeros((hid_p, out_p), cdt).at[:n_hid, :].set(w2e.astype(cdt))
    b2e = jnp.zeros((1, out_p), jnp.float32).at[0, :n_out].set(b2)
    b2p = b2e.at[0, score_lane].set(jnp.dot(b2, s[:, 0]))

    cap = _vmem_cap_bytes()
    w_bytes = (w1t.size + w2t.size) * itemsize + (b1p.size + b2p.size) * 4
    fused_vmem = (a_p.size * itemsize          # A VMEM scratch (single-buffered)
                  + x_p.size * itemsize        # x
                  + w_bytes
                  + n_p * hid_p * 4            # h (f32)
                  + 3 * n_p * out_p * 4        # xk / acc / gated temp (f32)
                  + n_p * out_p * 4)           # output
    use_tiled = force_tiled or (fused_vmem + (4 << 20) > int(0.9 * cap))

    if not use_tiled:
        flops = (2 * n_p * (f_in_p * hid_p + hid_p * out_p)
                 + 2 * hop * n_p * n_p * out_p)
        cost = pl.CostEstimate(
            flops=int(flops),
            transcendentals=int((hop + 1) * n_p),
            bytes_accessed=int((a_p.size + x_p.size) * itemsize + w_bytes
                               + n_p * out_p * 4))
        kernel = functools.partial(_dagnn_fused_kernel, hop=hop, score_lane=score_lane)
        out = pl.pallas_call(
            kernel,
            out_shape=jax.ShapeDtypeStruct((n_p, out_p), jnp.float32),
            in_specs=[pl.BlockSpec(memory_space=pltpu.MemorySpace.VMEM)] * 5
                     + [pl.BlockSpec(memory_space=pl.ANY)],
            out_specs=pl.BlockSpec(memory_space=pltpu.MemorySpace.VMEM),
            scratch_shapes=[pltpu.VMEM((n_p, n_p), cdt),
                            pltpu.SemaphoreType.DMA((1,))],
            compiler_params=pltpu.CompilerParams(
                vmem_limit_bytes=int(min(max(fused_vmem + (4 << 20), 32 << 20),
                                         int(0.95 * cap)))),
            cost_estimate=cost,
        )(x_p, w1t, b1p, w2t, b2p, a_p)
        return out[:N, :n_out]

    # ---- Tiled path: A never fully resident; hop kept at a call boundary. ----
    tm = min(tm, n_p)
    tk = min(tk, n_p)
    assert n_p % tm == 0 and n_p % tk == 0

    mlp_vmem = int(min(max(2 * (tm * f_in_p * itemsize + tm * out_p * (itemsize + 4))
                           + 2 * w_bytes + (2 << 20), 16 << 20), int(0.95 * cap)))
    mlp = pl.pallas_call(
        functools.partial(_mlp_kernel, score_lane=score_lane),
        out_shape=(jax.ShapeDtypeStruct((n_p, out_p), cdt),
                   jax.ShapeDtypeStruct((n_p, out_p), jnp.float32)),
        grid=(n_p // tm,),
        in_specs=[
            pl.BlockSpec((tm, f_in_p), lambda i: (i, 0)),
            pl.BlockSpec((f_in_p, hid_p), lambda i: (0, 0)),
            pl.BlockSpec((1, hid_p), lambda i: (0, 0)),
            pl.BlockSpec((hid_p, out_p), lambda i: (0, 0)),
            pl.BlockSpec((1, out_p), lambda i: (0, 0)),
        ],
        out_specs=(pl.BlockSpec((tm, out_p), lambda i: (i, 0)),
                   pl.BlockSpec((tm, out_p), lambda i: (i, 0))),
        compiler_params=pltpu.CompilerParams(
            dimension_semantics=("parallel",), vmem_limit_bytes=mlp_vmem),
    )
    xk, acc = mlp(x_p, w1t, b1p, w2t, b2p)

    hop_vmem = int(min(max(2 * (tm * tk + tk * out_p) * itemsize
                           + 2 * (tm * out_p * (4 + itemsize + 4))
                           + tm * out_p * 4 + (2 << 20), 16 << 20), int(0.95 * cap)))
    hop_cost = pl.CostEstimate(
        flops=int(2 * n_p * n_p * out_p),
        transcendentals=int(n_p),
        bytes_accessed=int(a_p.size * itemsize + 2 * n_p * out_p * itemsize
                           + 2 * n_p * out_p * 4))
    hop_call = pl.pallas_call(
        functools.partial(_hop_kernel, score_lane=score_lane),
        out_shape=(jax.ShapeDtypeStruct((n_p, out_p), cdt),
                   jax.ShapeDtypeStruct((n_p, out_p), jnp.float32)),
        grid=(n_p // tm, n_p // tk),
        in_specs=[
            pl.BlockSpec((tm, tk), lambda i, k: (i, k)),
            pl.BlockSpec((tk, out_p), lambda i, k: (k, 0)),
            pl.BlockSpec((tm, out_p), lambda i, k: (i, 0)),
        ],
        out_specs=(pl.BlockSpec((tm, out_p), lambda i, k: (i, 0)),
                   pl.BlockSpec((tm, out_p), lambda i, k: (i, 0))),
        scratch_shapes=[pltpu.VMEM((tm, out_p), jnp.float32)],
        input_output_aliases={2: 1},     # acc accumulates in place across hop calls
        compiler_params=pltpu.CompilerParams(
            dimension_semantics=("parallel", "arbitrary"),
            vmem_limit_bytes=hop_vmem),
        cost_estimate=hop_cost,
    )
    for _ in range(hop):
        xk, acc = hop_call(a_p, xk, acc)
    return acc[:N, :n_out]


# ----------------------------------------------------------------------------
# Parameter init mirroring DAGNN.reset_parameters(), pure-JAX reference, demo.
# ----------------------------------------------------------------------------
def init_dagnn_params(key, n_in, n_hid, n_out):
    k1, k2, k3, k4, k5 = jax.random.split(key, 5)

    def xavier(k, shape, gain):
        fan_out, fan_in = shape[0], shape[1]
        bound = gain * jnp.sqrt(6.0 / (fan_in + fan_out))
        return jax.random.uniform(k, shape, jnp.float32, -bound, bound)

    W1 = xavier(k1, (n_hid, n_in), jnp.sqrt(2.0))     # relu gain
    b1 = jax.random.uniform(k2, (n_hid,), jnp.float32, -0.1, 0.1)
    W2 = xavier(k3, (n_out, n_hid), 1.0)
    b2 = jax.random.uniform(k4, (n_out,), jnp.float32, -0.1, 0.1)
    s = xavier(k5, (n_out, 1), 1.0)                   # sigmoid gain == 1
    return (W1, b1, W2, b2, s)


def dagnn_reference(x, A, params, hop):
    W1, b1, W2, b2, s = params
    h = jnp.maximum(x @ W1.T + b1, 0.0)
    xk = h @ W2.T + b2
    outs = [xk]
    for _ in range(hop):
        xk = A @ xk
        outs.append(xk)
    H = jnp.stack(outs, axis=1)                 # (N, hop+1, n_out)
    S = jnp.transpose(jax.nn.sigmoid(H @ s), (0, 2, 1))
    return jnp.squeeze(S @ H, axis=1)


def _make_graph(key, n):
    adj = (jax.random.uniform(key, (n, n)) > 0.9).astype(jnp.float32)
    adj = jnp.maximum(adj, adj.T) + jnp.eye(n, dtype=jnp.float32)
    d_inv_sqrt = 1.0 / jnp.sqrt(jnp.sum(adj, axis=1))
    return adj * d_inv_sqrt[:, None] * d_inv_sqrt[None, :]


if __name__ == "__main__":
    hop = 4
    n_in, n_hid, n_out = 32, 64, 16

    # --- problem 1: small graph -> fully-fused VMEM-resident kernel ----------
    N1 = 64
    k_x1, k_a1, k_p = jax.random.split(jax.random.PRNGKey(0), 3)
    x1 = jax.random.normal(k_x1, (N1, n_in), jnp.float32)
    A1 = _make_graph(k_a1, N1)
    params = init_dagnn_params(k_p, n_in, n_hid, n_out)
    ref1 = dagnn_reference(x1, A1, params, hop)

    out_f32 = dagnn_forward(x1, A1, params, hop=hop, compute_dtype=jnp.float32)
    jax.block_until_ready(out_f32)
    assert jnp.allclose(out_f32, ref1, atol=2e-4, rtol=2e-4), "f32 fused mismatch"

    out_bf16 = dagnn_forward(x1, A1, params, hop=hop, compute_dtype=jnp.bfloat16)
    jax.block_until_ready(out_bf16)
    err1 = jnp.max(jnp.abs(out_bf16 - ref1))
    assert err1 <= 0.05 * (1.0 + jnp.max(jnp.abs(ref1))), "bf16 fused drift too large"

    # --- problem 2: exercise the tiled / per-hop path (large-A fallback) -----
    N2 = 256
    k_x2, k_a2 = jax.random.split(jax.random.PRNGKey(1), 2)
    x2 = jax.random.normal(k_x2, (N2, n_in), jnp.float32)
    A2 = _make_graph(k_a2, N2)
    ref2 = dagnn_reference(x2, A2, params, hop)

    out_tiled = dagnn_forward(x2, A2, params, hop=hop,
                              compute_dtype=jnp.bfloat16, force_tiled=True)
    jax.block_until_ready(out_tiled)
    err2 = jnp.max(jnp.abs(out_tiled - ref2))
    assert err2 <= 0.05 * (1.0 + jnp.max(jnp.abs(ref2))), "tiled bf16 drift too large"

    print("KERNEL_OK")
</pallas_src>

<mosaic_0001>
module attributes {stable_mosaic.version = 11 : i64} {
  func.func @_dagnn_fused_kernel(%arg0: memref<128x128xf32, #tpu.memory_space<vmem>>, %arg1: memref<128x128xf32, #tpu.memory_space<vmem>>, %arg2: memref<1x128xf32, #tpu.memory_space<vmem>>, %arg3: memref<128x128xf32, #tpu.memory_space<vmem>>, %arg4: memref<1x128xf32, #tpu.memory_space<vmem>>, %arg5: memref<128x128xf32, #tpu.memory_space<any>>, %arg6: memref<128x128xf32, #tpu.memory_space<vmem>>, %arg7: memref<128x128xf32, #tpu.memory_space<vmem>>, %arg8: memref<1x!tpu.dma_semaphore, #tpu.memory_space<semaphore_mem>>) attributes {dimension_semantics = [], scalar_prefetch = 0 : i64, scratch_operands = 2 : i64, tpu.core_type = #tpu.core_type<tc>} {
    %c0_i32 = arith.constant 0 : i32
    %0 = tpu.memref_slice %arg8[%c0_i32] : memref<1x!tpu.dma_semaphore, #tpu.memory_space<semaphore_mem>> -> memref<1x!tpu.dma_semaphore, #tpu.memory_space<semaphore_mem>>
    %1 = tpu.memref_squeeze %0 : memref<1x!tpu.dma_semaphore, #tpu.memory_space<semaphore_mem>> -> memref<!tpu.dma_semaphore, #tpu.memory_space<semaphore_mem>>
    tpu.enqueue_dma source(%arg5 : memref<128x128xf32, #tpu.memory_space<any>>) target(%arg7 : memref<128x128xf32, #tpu.memory_space<vmem>>) target_semaphore(%1 : memref<!tpu.dma_semaphore, #tpu.memory_space<semaphore_mem>>)
    %c0 = arith.constant 0 : index
    %c0_0 = arith.constant 0 : index
    %2 = vector.load %arg0[%c0, %c0_0] : memref<128x128xf32, #tpu.memory_space<vmem>>, vector<128x128xf32>
    %c0_1 = arith.constant 0 : index
    %c0_2 = arith.constant 0 : index
    %3 = vector.load %arg1[%c0_1, %c0_2] : memref<128x128xf32, #tpu.memory_space<vmem>>, vector<128x128xf32>
    %cst = arith.constant dense<0.000000e+00> : vector<128x128xf32>
    %4 = tpu.matmul %2, %3, %cst {dimension_numbers = #tpu.dot_dimension_numbers<[1], [0], [0], [1], [0, 0, 1, 1], [], []>} : vector<128x128xf32>, vector<128x128xf32>, vector<128x128xf32> -> vector<128x128xf32>
    %c0_3 = arith.constant 0 : index
    %c0_4 = arith.constant 0 : index
    %5 = vector.load %arg2[%c0_3, %c0_4] : memref<1x128xf32, #tpu.memory_space<vmem>>, vector<1x128xf32>
    %6 = vector.broadcast %5 : vector<1x128xf32> to vector<128x128xf32>
    %7 = arith.addf %4, %6 : vector<128x128xf32>
    %cst_5 = arith.constant 0.000000e+00 : f32
    %8 = vector.broadcast %cst_5 : f32 to vector<128x128xf32>
    %9 = arith.maximumf %7, %8 : vector<128x128xf32>
    %c0_6 = arith.constant 0 : index
    %c0_7 = arith.constant 0 : index
    %10 = vector.load %arg3[%c0_6, %c0_7] : memref<128x128xf32, #tpu.memory_space<vmem>>, vector<128x128xf32>
    %cst_8 = arith.constant dense<0.000000e+00> : vector<128x128xf32>
    %11 = tpu.matmul %9, %10, %cst_8 {dimension_numbers = #tpu.dot_dimension_numbers<[1], [0], [0], [1], [0, 0, 1, 1], [], []>} : vector<128x128xf32>, vector<128x128xf32>, vector<128x128xf32> -> vector<128x128xf32>
    %c0_9 = arith.constant 0 : index
    %c0_10 = arith.constant 0 : index
    %12 = vector.load %arg4[%c0_9, %c0_10] : memref<1x128xf32, #tpu.memory_space<vmem>>, vector<1x128xf32>
    %13 = vector.broadcast %12 : vector<1x128xf32> to vector<128x128xf32>
    %14 = arith.addf %11, %13 : vector<128x128xf32>
    %15 = vector.extract_strided_slice %14 {offsets = [0, 16], sizes = [128, 1], strides = [1, 1]} : vector<128x128xf32> to vector<128x1xf32>
    %16 = arith.negf %15 : vector<128x1xf32>
    %17 = math.exp %16 : vector<128x1xf32>
    %cst_11 = arith.constant 1.000000e+00 : f32
    %18 = vector.broadcast %cst_11 : f32 to vector<128x1xf32>
    %19 = arith.addf %18, %17 : vector<128x1xf32>
    %20 = arith.divf %18, %19 : vector<128x1xf32>
    %21 = vector.broadcast %20 : vector<128x1xf32> to vector<128x128xf32>
    %22 = arith.mulf %21, %14 : vector<128x128xf32>
    %c0_i32_12 = arith.constant 0 : i32
    %23 = tpu.memref_slice %arg8[%c0_i32_12] : memref<1x!tpu.dma_semaphore, #tpu.memory_space<semaphore_mem>> -> memref<1x!tpu.dma_semaphore, #tpu.memory_space<semaphore_mem>>
    %24 = tpu.memref_squeeze %23 : memref<1x!tpu.dma_semaphore, #tpu.memory_space<semaphore_mem>> -> memref<!tpu.dma_semaphore, #tpu.memory_space<semaphore_mem>>
    tpu.wait_dma2 semaphore(%24 : memref<!tpu.dma_semaphore, #tpu.memory_space<semaphore_mem>>) src(%arg5 : memref<128x128xf32, #tpu.memory_space<any>>) dst(%arg7 : memref<128x128xf32, #tpu.memory_space<vmem>>)
    %c0_13 = arith.constant 0 : index
    %c0_14 = arith.constant 0 : index
    %25 = vector.load %arg7[%c0_13, %c0_14] : memref<128x128xf32, #tpu.memory_space<vmem>>, vector<128x128xf32>
    %c0_i32_15 = arith.constant 0 : i32
    %cst_16 = arith.constant dense<0.000000e+00> : vector<128x128xf32>
    %26 = tpu.matmul %25, %14, %cst_16 {dimension_numbers = #tpu.dot_dimension_numbers<[1], [0], [0], [1], [0, 0, 1, 1], [], []>} : vector<128x128xf32>, vector<128x128xf32>, vector<128x128xf32> -> vector<128x128xf32>
    %27 = vector.extract_strided_slice %26 {offsets = [0, 16], sizes = [128, 1], strides = [1, 1]} : vector<128x128xf32> to vector<128x1xf32>
    %28 = arith.negf %27 : vector<128x1xf32>
    %29 = math.exp %28 : vector<128x1xf32>
    %cst_17 = arith.constant 1.000000e+00 : f32
    %30 = vector.broadcast %cst_17 : f32 to vector<128x1xf32>
    %31 = arith.addf %30, %29 : vector<128x1xf32>
    %32 = arith.divf %30, %31 : vector<128x1xf32>
    %33 = vector.broadcast %32 : vector<128x1xf32> to vector<128x128xf32>
    %34 = arith.mulf %33, %26 : vector<128x128xf32>
    %35 = arith.addf %22, %34 : vector<128x128xf32>
    %c1_i32 = arith.constant 1 : i32
    %cst_18 = arith.constant dense<0.000000e+00> : vector<128x128xf32>
    %36 = tpu.matmul %25, %26, %cst_18 {dimension_numbers = #tpu.dot_dimension_numbers<[1], [0], [0], [1], [0, 0, 1, 1], [], []>} : vector<128x128xf32>, vector<128x128xf32>, vector<128x128xf32> -> vector<128x128xf32>
    %37 = vector.extract_strided_slice %36 {offsets = [0, 16], sizes = [128, 1], strides = [1, 1]} : vector<128x128xf32> to vector<128x1xf32>
    %38 = arith.negf %37 : vector<128x1xf32>
    %39 = math.exp %38 : vector<128x1xf32>
    %cst_19 = arith.constant 1.000000e+00 : f32
    %40 = vector.broadcast %cst_19 : f32 to vector<128x1xf32>
    %41 = arith.addf %40, %39 : vector<128x1xf32>
    %42 = arith.divf %40, %41 : vector<128x1xf32>
    %43 = vector.broadcast %42 : vector<128x1xf32> to vector<128x128xf32>
    %44 = arith.mulf %43, %36 : vector<128x128xf32>
    %45 = arith.addf %35, %44 : vector<128x128xf32>
    %c2_i32 = arith.constant 2 : i32
    %cst_20 = arith.constant dense<0.000000e+00> : vector<128x128xf32>
    %46 = tpu.matmul %25, %36, %cst_20 {dimension_numbers = #tpu.dot_dimension_numbers<[1], [0], [0], [1], [0, 0, 1, 1], [], []>} : vector<128x128xf32>, vector<128x128xf32>, vector<128x128xf32> -> vector<128x128xf32>
    %47 = vector.extract_strided_slice %46 {offsets = [0, 16], sizes = [128, 1], strides = [1, 1]} : vector<128x128xf32> to vector<128x1xf32>
    %48 = arith.negf %47 : vector<128x1xf32>
    %49 = math.exp %48 : vector<128x1xf32>
    %cst_21 = arith.constant 1.000000e+00 : f32
    %50 = vector.broadcast %cst_21 : f32 to vector<128x1xf32>
    %51 = arith.addf %50, %49 : vector<128x1xf32>
    %52 = arith.divf %50, %51 : vector<128x1xf32>
    %53 = vector.broadcast %52 : vector<128x1xf32> to vector<128x128xf32>
    %54 = arith.mulf %53, %46 : vector<128x128xf32>
    %55 = arith.addf %45, %54 : vector<128x128xf32>
    %c3_i32 = arith.constant 3 : i32
    %cst_22 = arith.constant dense<0.000000e+00> : vector<128x128xf32>
    %56 = tpu.matmul %25, %46, %cst_22 {dimension_numbers = #tpu.dot_dimension_numbers<[1], [0], [0], [1], [0, 0, 1, 1], [], []>} : vector<128x128xf32>, vector<128x128xf32>, vector<128x128xf32> -> vector<128x128xf32>
    %57 = vector.extract_strided_slice %56 {offsets = [0, 16], sizes = [128, 1], strides = [1, 1]} : vector<128x128xf32> to vector<128x1xf32>
    %58 = arith.negf %57 : vector<128x1xf32>
    %59 = math.exp %58 : vector<128x1xf32>
    %cst_23 = arith.constant 1.000000e+00 : f32
    %60 = vector.broadcast %cst_23 : f32 to vector<128x1xf32>
    %61 = arith.addf %60, %59 : vector<128x1xf32>
    %62 = arith.divf %60, %61 : vector<128x1xf32>
    %63 = vector.broadcast %62 : vector<128x1xf32> to vector<128x128xf32>
    %64 = arith.mulf %63, %56 : vector<128x128xf32>
    %65 = arith.addf %55, %64 : vector<128x128xf32>
    %c0_24 = arith.constant 0 : index
    %c0_25 = arith.constant 0 : index
    %66 = vector.load %arg6[%c0_24, %c0_25] : memref<128x128xf32, #tpu.memory_space<vmem>>, vector<128x128xf32>
    tpu.vector_store %arg6[%c0_24, %c0_25], %65 {strides = array<i32>} : memref<128x128xf32, #tpu.memory_space<vmem>>, vector<128x128xf32>,
    return
  }
}

</mosaic_0001>

<bundles_post_ra>
// kernel: tpu_custom_call.1
= control target key start
LH: loop header
LB: loop body
LE: loop exit
PB: predicated region body
PF: predicated region fallthrough
CT: control target
= control target key end

     0   :  { %11 = vsyncpa [#allocation5], 0  ;;  %s4174_s0 = inlined_call_operand.hbm [shape: f32[128,128], index: 0, kind: input, shape index: {}]   ;;  %s4175_s1 = inlined_call_operand.hbm [shape: f32[128,128], index: 1, kind: input, shape index: {}]   ;;  %s4176_s2 = inlined_call_operand.vmem [shape: f32[1,128], index: 2, kind: input, shape index: {}]   ;;  %s4177_s3 = inlined_call_operand.hbm [shape: f32[128,128], index: 3, kind: input, shape index: {}]   ;;  %s4178_s4 = inlined_call_operand.vmem [shape: f32[1,128], index: 4, kind: input, shape index: {}]   ;;  %s4179_s5 = inlined_call_operand.hbm [shape: f32[128,128], index: 5, kind: input, shape index: {}]   ;;  %s4180_s6 = inlined_call_operand.hbm [shape: f32[128,128], index: 6, kind: output, shape index: {}]  }
   0x1   :  { %12 = vsyncpa [#allocation8], 0 }
   0x2   :  { %13 = vsyncpa [#allocation6], 0  ;;  %s3373_s21 = smov [#allocation7]   ;;  %s3374_s23 = smov [#allocation4]  }
   0x3   :  { %s31_s22 = sshll.u32 %s3373_s21, 4  ;;  %s19_s24 = sshll.u32 %s3374_s23, 4  ;;  %s32_s22 = int_to_ptr.vmem [resolvable:$true] %s31_s22  ;;  %s3416_s24 = int_to_ptr.vmem [resolvable:$true] %s19_s24 }
   0x4   :  { %s3255_s27 = scalar_lea.hbm %s4175_s1, 2048 }
   0x5   :  { %p3256_p0 = scmp.ne.s32.totalorder %s4175_s1, %s3255_s27  ;;  %p3259_p1 = scmp.lt.u32.totalorder %s3255_s27, %s4175_s1 }
   0x7   :  { %p3261_p2 = pnand %p3259_p1, %p3256_p0 }
   0x9   :  { %3264 = shalt.err (!%p3261_p2)
}
   0xa   :  { %s3265_s8 = scalar_lea.vmem %s32_s22, 2048  ;;  %p3270_p4 = scmp.lt.s32.totalorder %s32_s22, %s32_s22 }
   0xb   :  { %p3266_p3 = scmp.ne.s32.totalorder %s32_s22, %s3265_s8  ;;  %p3271_p5 = scmp.lt.s32.totalorder %s3265_s8, %s3265_s8 }
   0xd   :  { %p3272_p6 = por %p3271_p5, %p3270_p4 }
   0xf   :  { %p3273_p7 = pnand %p3272_p6, %p3266_p3 }
  0x11   :  { %3276 = shalt.err (!%p3273_p7)
}
  0x12   :  { %s3375_s9 = smov 128   ;;  %s3376_s10 = smov 8  }
  0x13   :  { %37 = dma.hbm_to_vmem [thread:$0]  %s4175_s1, 2048, %s32_s22, [#allocation8], %s3375_s9, %s3375_s9, %s3376_s10  }
  0x14   :  { %s3277_s15 = scalar_lea.hbm %s4174_s0, 2048 }
  0x15   :  { %p3278_p8 = scmp.ne.s32.totalorder %s4174_s0, %s3277_s15  ;;  %p3281_p9 = scmp.lt.u32.totalorder %s3277_s15, %s4174_s0 }
  0x17   :  { %p3283_p10 = pnand %p3281_p9, %p3278_p8 }
  0x19   :  { %3286 = shalt.err (!%p3283_p10)
}
  0x1a   :  { %s3287_s20 = scalar_lea.vmem %s3416_s24, 2048  ;;  %p3292_p12 = scmp.lt.s32.totalorder %s3416_s24, %s3416_s24 }
  0x1b   :  { %p3288_p11 = scmp.ne.s32.totalorder %s3416_s24, %s3287_s20  ;;  %p3293_p13 = scmp.lt.s32.totalorder %s3287_s20, %s3287_s20 }
  0x1d   :  { %p3294_p0 = por %p3293_p13, %p3292_p12 }
  0x1f   :  { %p3295_p1 = pnand %p3294_p0, %p3288_p11 }
  0x21   :  { %3298 = shalt.err (!%p3295_p1)
}
  0x22   :  { %25 = dma.hbm_to_vmem [thread:$0]  %s4174_s0, 2048, %s3416_s24, [#allocation5], %s3375_s9, %s3375_s9, %s3376_s10  }
  0x23   :  { %s3377_s22 = smov [#allocation9]   ;;  %s3299_s27 = scalar_lea.hbm %s4177_s3, 2048 }
  0x24   :  { %s45_s23 = sshll.u32 %s3377_s22, 4  ;;  %p3300_p2 = scmp.ne.s32.totalorder %s4177_s3, %s3299_s27  ;;  %s46_s23 = int_to_ptr.vmem [resolvable:$true] %s45_s23 }
  0x25   :  { %p3303_p3 = scmp.lt.u32.totalorder %s3299_s27, %s4177_s3 }
  0x27   :  { %p3305_p4 = pnand %p3303_p3, %p3300_p2 }
  0x29   :  { %3308 = shalt.err (!%p3305_p4)
}
  0x2a   :  { %s3309_s8 = scalar_lea.vmem %s46_s23, 2048  ;;  %p3314_p6 = scmp.lt.s32.totalorder %s46_s23, %s46_s23 }
  0x2b   :  { %p3310_p5 = scmp.ne.s32.totalorder %s46_s23, %s3309_s8  ;;  %p3315_p7 = scmp.lt.s32.totalorder %s3309_s8, %s3309_s8 }
  0x2d   :  { %p3316_p8 = por %p3315_p7, %p3314_p6 }
  0x2f   :  { %p3317_p9 = pnand %p3316_p8, %p3310_p5 }
  0x31   :  { %3320 = shalt.err (!%p3317_p9)
}
  0x32   :  { %51 = dma.hbm_to_vmem [thread:$0]  %s4177_s3, 2048, %s46_s23, [#allocation8], %s3375_s9, %s3375_s9, %s3376_s10  }
  0x33   :  { %3365 = dma.done.wait [#allocation5], 2048  }
  0x34   :  { %3366 = vsyncadd [#allocation5], 4294965248 }
  0x35   :  { %3367 = dma.done.wait [#allocation8], 4096  }
  0x36   :  { %3368 = vsyncadd [#allocation8], 4294963200  ;;  %v90_v0 = vld [vmem:[#allocation7] sm:$0xff]  ;;  %v91_v1 = vld [vmem:[#allocation7 + $0x8] sm:$0xff]  ;;  %s3321_s16 = scalar_lea.hbm %s4179_s5, 2048 }
  0x37   :  { %v92_v2 = vld [vmem:[#allocation7 + $0x10] sm:$0xff]  ;;  %v2716_v3 = vpack.c.bf16 %v91_v1, %v90_v0  ;;  %v93_v4 = vld [vmem:[#allocation7 + $0x18] sm:$0xff]  ;;  %v94_v6 = vld [vmem:[#allocation7 + $0x20] sm:$0xff]  ;;  %p3322_p10 = scmp.ne.s32.totalorder %s4179_s5, %s3321_s16  ;;  %p3325_p11 = scmp.lt.u32.totalorder %s3321_s16, %s4179_s5 }
  0x38   :  { %v2720_v5 = vpack.c.bf16 %v93_v4, %v92_v2  ;;  %v95_v7 = vld [vmem:[#allocation7 + $0x28] sm:$0xff]  ;;  %v74_v9 = vld [vmem:[#allocation4] sm:$0xff]  ;;  %v96_v10 = vld [vmem:[#allocation7 + $0x30] sm:$0xff] }
  0x39   :  { %2717 = vmatprep.subr.bf16.mxu0 %v2716_v3  ;;  %v2724_v8 = vpack.c.bf16 %v95_v7, %v94_v6  ;;  %v97_v11 = vld [vmem:[#allocation7 + $0x38] sm:$0xff]  ;;  %2412 = vmatprep.mubr.f32.mxu0 %v74_v9  ;;  %v98_v13 = vld [vmem:[#allocation7 + $0x40] sm:$0xff]  ;;  %v99_v14 = vld [vmem:[#allocation7 + $0x48] sm:$0xff]  ;;  %p3327_p12 = pnand %p3325_p11, %p3322_p10 }
  0x3a   :  { %2719 = vmatpush3.bf16.msra.mxu0 %v2716_v3  ;;  %v2728_v12 = vpack.c.bf16 %v97_v11, %v96_v10  ;;  %v274_v15 = vld [vmem:[#allocation9] sm:$0xff]  ;;  %v275_v16 = vld [vmem:[#allocation9 + $0x8] sm:$0xff]  ;;  %v276_v17 = vld [vmem:[#allocation9 + $0x10] sm:$0xff]  ;;  %v2732_v21 = vpack.c.bf16 %v99_v14, %v98_v13 }
  0x3b   :  { %2721 = vmatprep.subr.bf16.mxu0 %v2720_v5  ;;  %v277_v18 = vld [vmem:[#allocation9 + $0x18] sm:$0xff]  ;;  %v2748_v19 = vpack.c.bf16 %v275_v16, %v274_v15  ;;  %v278_v22 = vld [vmem:[#allocation9 + $0x20] sm:$0xff]  ;;  %v279_v23 = vld [vmem:[#allocation9 + $0x28] sm:$0xff] }
  0x3c   :  { %v2752_v20 = vpack.c.bf16 %v277_v18, %v276_v17  ;;  %v100_v24 = vld [vmem:[#allocation7 + $0x50] sm:$0xff]  ;;  %v101_v25 = vld [vmem:[#allocation7 + $0x58] sm:$0xff]  ;;  %v2756_v26 = vpack.c.bf16 %v279_v23, %v278_v22  ;;  %v102_v30 = vld [vmem:[#allocation7 + $0x60] sm:$0xff] }
  0x3d   :  { %2749 = vmatprep.subr.bf16.mxu1 %v2748_v19  ;;  %v2736_v27 = vpack.c.bf16 %v101_v25, %v100_v24  ;;  %v280_v28 = vld [vmem:[#allocation9 + $0x30] sm:$0xff]  ;;  %v281_v29 = vld [vmem:[#allocation9 + $0x38] sm:$0xff]  ;;  %v103_v31 = vld [vmem:[#allocation7 + $0x68] sm:$0xff] }
  0x3e   :  { %2723 = vmatpush3.bf16.msra.mxu0 %v2720_v5  ;;  %2751 = vmatpush3.bf16.msra.mxu1 %v2748_v19  ;;  %v2760_v32 = vpack.c.bf16 %v281_v29, %v280_v28  ;;  %v2740_v33 = vpack.c.bf16 %v103_v31, %v102_v30  ;;  %v282_v34 = vld [vmem:[#allocation9 + $0x40] sm:$0xff]  ;;  %v283_v35 = vld [vmem:[#allocation9 + $0x48] sm:$0xff]  ;;  %v104_v36 = vld [vmem:[#allocation7 + $0x70] sm:$0xff] }
  0x3f   :  { %2725 = vmatprep.subr.bf16.mxu0 %v2724_v8  ;;  %2753 = vmatprep.subr.bf16.mxu1 %v2752_v20  ;;  %v105_v37 = vld [vmem:[#allocation7 + $0x78] sm:$0xff]  ;;  %v2764_v38 = vpack.c.bf16 %v283_v35, %v282_v34  ;;  %v284_v40 = vld [vmem:[#allocation9 + $0x50] sm:$0xff]  ;;  %v286_v43 = vld [vmem:[#allocation9 + $0x60] sm:$0xff] }
  0x40   :  { %v2744_v39 = vpack.c.bf16 %v105_v37, %v104_v36  ;;  %v285_v41 = vld [vmem:[#allocation9 + $0x58] sm:$0xff]  ;;  %v287_v44 = vld [vmem:[#allocation9 + $0x68] sm:$0xff]  ;;  %v76_v47 = vld [vmem:[#allocation4 + $0x10] sm:$0xff] }
  0x41   :  { %v2768_v42 = vpack.c.bf16 %v285_v41, %v284_v40  ;;  %v75_v45 = vld [vmem:[#allocation4 + $0x8] sm:$0xff]  ;;  %v2772_v46 = vpack.c.bf16 %v287_v44, %v286_v43  ;;  %v77_v48 = vld [vmem:[#allocation4 + $0x18] sm:$0xff]  ;;  %v78_v49 = vld [vmem:[#allocation4 + $0x20] sm:$0xff] }
  0x42   :  { %2727 = vmatpush3.bf16.msra.mxu0 %v2724_v8  ;;  %2755 = vmatpush3.bf16.msra.mxu1 %v2752_v20  ;;  %v79_v50 = vld [vmem:[#allocation4 + $0x28] sm:$0xff]  ;;  %v80_v51 = vld [vmem:[#allocation4 + $0x30] sm:$0xff]  ;;  %v81_v52 = vld [vmem:[#allocation4 + $0x38] sm:$0xff] }
  0x43   :  { %2729 = vmatprep.subr.bf16.mxu0 %v2728_v12  ;;  %2757 = vmatprep.subr.bf16.mxu1 %v2756_v26  ;;  %v82_v53 = vld [vmem:[#allocation4 + $0x40] sm:$0xff]  ;;  %v83_v54 = vld [vmem:[#allocation4 + $0x48] sm:$0xff]  ;;  %v84_v55 = vld [vmem:[#allocation4 + $0x50] sm:$0xff] }
  0x44   :  { %v85_v56 = vld [vmem:[#allocation4 + $0x58] sm:$0xff]  ;;  %v86_v57 = vld [vmem:[#allocation4 + $0x60] sm:$0xff]  ;;  %v87_v58 = vld [vmem:[#allocation4 + $0x68] sm:$0xff] }
  0x45   :  { %v88_v59 = vld [vmem:[#allocation4 + $0x70] sm:$0xff]  ;;  %v89_v60 = vld [vmem:[#allocation4 + $0x78] sm:$0xff]  ;;  %v2105_v0 = vld [vmem:[%s4176_s2] ss:$0 sm:$0xff] }
  0x46   :  { %2731 = vmatpush3.bf16.msra.mxu0 %v2728_v12  ;;  %2759 = vmatpush3.bf16.msra.mxu1 %v2756_v26  ;;  %v288_v61 = vld [vmem:[#allocation9 + $0x70] sm:$0xff]  ;;  %v289_v62 = vld [vmem:[#allocation9 + $0x78] sm:$0xff] }
  0x47   :  { %2733 = vmatprep.subr.bf16.mxu0 %v2732_v21  ;;  %2761 = vmatprep.subr.bf16.mxu1 %v2760_v32  ;;  %v2776_v63 = vpack.c.bf16 %v289_v62, %v288_v61 }
  0x4a   :  { %2735 = vmatpush3.bf16.msra.mxu0 %v2732_v21  ;;  %2763 = vmatpush3.bf16.msra.mxu1 %v2760_v32 }
  0x4b   :  { %2737 = vmatprep.subr.bf16.mxu0 %v2736_v27  ;;  %2765 = vmatprep.subr.bf16.mxu1 %v2764_v38 }
  0x4e   :  { %2739 = vmatpush3.bf16.msra.mxu0 %v2736_v27  ;;  %2767 = vmatpush3.bf16.msra.mxu1 %v2764_v38 }
  0x4f   :  { %2741 = vmatprep.subr.bf16.mxu0 %v2740_v33  ;;  %2769 = vmatprep.subr.bf16.mxu1 %v2768_v42 }
  0x52   :  { %2743 = vmatpush3.bf16.msra.mxu0 %v2740_v33  ;;  %2771 = vmatpush3.bf16.msra.mxu1 %v2768_v42 }
  0x53   :  { %2745 = vmatprep.subr.bf16.mxu0 %v2744_v39  ;;  %2773 = vmatprep.subr.bf16.mxu1 %v2772_v46 }
  0x56   :  { %2747 = vmatpush3.bf16.msra.mxu0 %v2744_v39  ;;  %2775 = vmatpush3.bf16.msra.mxu1 %v2772_v46 }
  0x57   :  { %2777 = vmatprep.subr.bf16.mxu1 %v2776_v63 }
  0x59   :  { %2413 = vmatmul.mubr.f32.vlgmr.msra.gmra.mrb[0].mxu0 %v75_v45 }
  0x5a   :  { %2415 = vmatprep.mubr.f32.mxu0 %v76_v47  ;;  %2779 = vmatpush3.bf16.msra.mxu1 %v2776_v63 }
  0x5d   :  { %2416 = vmatmul.mubr.f32.gmra.mrb[2].mxu0 %v77_v48 }
  0x5e   :  { %2418 = vmatprep.mubr.f32.mxu0 %v78_v49  ;;  %v3378_v49 = vmov 16  }
  0x5f   :  { %2916 = vset.pattern.permute.xlu0 %v3378_v49  ;;  %2917 = vset.pattern.permute.xlu1 %v3378_v49 }
  0x61   :  { %2419 = vmatmul.mubr.f32.gmra.mrb[4].mxu0 %v79_v50  ;;  %v3476_v50 = vld [vmem:[%s4178_s4] ss:$0 sm:$0xff]  ;;  %s3379_s4 = smov [#allocation2]  }
  0x62   :  { %2421 = vmatprep.mubr.f32.mxu0 %v80_v51  ;;  %s70_s13 = sshll.u32 %s3379_s4, 4  ;;  %s71_s13 = int_to_ptr.vmem [resolvable:$true] %s70_s13 }
  0x65   :  { %2422 = vmatmul.mubr.f32.gmra.mrb[6].mxu0 %v81_v52 }
  0x66   :  { %2424 = vmatprep.mubr.f32.mxu0 %v82_v53 }
  0x69   :  { %2425 = vmatmul.mubr.f32.gmra.mrb[8].mxu0 %v83_v54 }
  0x6a   :  { %2427 = vmatprep.mubr.f32.mxu0 %v84_v55 }
  0x6d   :  { %2428 = vmatmul.mubr.f32.gmra.mrb[10].mxu0 %v85_v56 }
  0x6e   :  { %2430 = vmatprep.mubr.f32.mxu0 %v86_v57 }
  0x71   :  { %2431 = vmatmul.mubr.f32.gmra.mrb[12].mxu0 %v87_v58 }
  0x72   :  { %2433 = vmatprep.mubr.f32.mxu0 %v88_v59 }
  0x75   :  { %2434 = vmatmul.mubr.f32.gmra.mrb[14].mxu0 %v89_v60 }
 0x12c   :  { %v2414_v1 = vpop.f32.mrb[0].mxu0 }
 0x12d   :  { %v185_v2 = vadd.f32 %v2414_v1, %v2105_v0  ;;  %v179_v3 = vpop.f32.mrb[1].mxu0 }
 0x12e   :  { %v180_v4 = vadd.f32 %v2105_v0, %v179_v3 }
 0x12f   :  { %v259_v7 = vmax.f32 %v185_v2, 0.0 }
 0x130   :  { %v2417_v5 = vpop.f32.mrb[2].mxu0  ;;  %v258_v6 = vmax.f32 %v180_v4, 0.0 }
 0x131   :  { %v195_v8 = vadd.f32 %v2417_v5, %v2105_v0  ;;  %v189_v9 = vpop.f32.mrb[3].mxu0 }
 0x132   :  { %v190_v10 = vadd.f32 %v2105_v0, %v189_v9  ;;  %2468 = vmatprep.mubr.f32.mxu1 %v258_v6 }
 0x133   :  { %2469 = vmatmul.mubr.f32.vlgmr.msra.gmra.mrb[0].mxu1 %v259_v7  ;;  %v261_v13 = vmax.f32 %v195_v8, 0.0 }
 0x134   :  { %v260_v11 = vmax.f32 %v190_v10, 0.0  ;;  %v2420_v12 = vpop.f32.mrb[4].mxu0 }
 0x135   :  { %v205_v14 = vadd.f32 %v2420_v12, %v2105_v0  ;;  %v199_v15 = vpop.f32.mrb[5].mxu0 }
 0x136   :  { %v200_v16 = vadd.f32 %v2105_v0, %v199_v15  ;;  %2471 = vmatprep.mubr.f32.mxu1 %v260_v11 }
 0x137   :  { %v263_v17 = vmax.f32 %v205_v14, 0.0  ;;  %2472 = vmatmul.mubr.f32.gmra.mrb[2].mxu1 %v261_v13 }
 0x138   :  { %v262_v18 = vmax.f32 %v200_v16, 0.0  ;;  %v2423_v19 = vpop.f32.mrb[6].mxu0 }
 0x139   :  { %v215_v20 = vadd.f32 %v2423_v19, %v2105_v0  ;;  %v209_v21 = vpop.f32.mrb[7].mxu0 }
 0x13a   :  { %v210_v22 = vadd.f32 %v2105_v0, %v209_v21  ;;  %2474 = vmatprep.mubr.f32.mxu1 %v262_v18 }
 0x13b   :  { %v265_v23 = vmax.f32 %v215_v20, 0.0  ;;  %2475 = vmatmul.mubr.f32.gmra.mrb[4].mxu1 %v263_v17 }
 0x13c   :  { %v264_v24 = vmax.f32 %v210_v22, 0.0  ;;  %v2426_v25 = vpop.f32.mrb[8].mxu0 }
 0x13d   :  { %v225_v26 = vadd.f32 %v2426_v25, %v2105_v0  ;;  %v219_v27 = vpop.f32.mrb[9].mxu0 }
 0x13e   :  { %v220_v28 = vadd.f32 %v2105_v0, %v219_v27  ;;  %2477 = vmatprep.mubr.f32.mxu1 %v264_v24 }
 0x13f   :  { %v267_v29 = vmax.f32 %v225_v26, 0.0  ;;  %2478 = vmatmul.mubr.f32.gmra.mrb[6].mxu1 %v265_v23 }
 0x140   :  { %v266_v30 = vmax.f32 %v220_v28, 0.0  ;;  %v2429_v31 = vpop.f32.mrb[10].mxu0 }
 0x141   :  { %v235_v32 = vadd.f32 %v2429_v31, %v2105_v0  ;;  %v229_v33 = vpop.f32.mrb[11].mxu0 }
 0x142   :  { %v230_v34 = vadd.f32 %v2105_v0, %v229_v33  ;;  %2480 = vmatprep.mubr.f32.mxu1 %v266_v30 }
 0x143   :  { %v269_v35 = vmax.f32 %v235_v32, 0.0  ;;  %2481 = vmatmul.mubr.f32.gmra.mrb[8].mxu1 %v267_v29 }
 0x144   :  { %v268_v36 = vmax.f32 %v230_v34, 0.0  ;;  %v2432_v37 = vpop.f32.mrb[12].mxu0 }
 0x145   :  { %v245_v38 = vadd.f32 %v2432_v37, %v2105_v0  ;;  %v239_v39 = vpop.f32.mrb[13].mxu0 }
 0x146   :  { %v240_v40 = vadd.f32 %v2105_v0, %v239_v39  ;;  %2483 = vmatprep.mubr.f32.mxu1 %v268_v36 }
 0x147   :  { %v271_v41 = vmax.f32 %v245_v38, 0.0  ;;  %2484 = vmatmul.mubr.f32.gmra.mrb[10].mxu1 %v269_v35 }
 0x148   :  { %v270_v42 = vmax.f32 %v240_v40, 0.0  ;;  %v2435_v43 = vpop.f32.mrb[14].mxu0 }
 0x149   :  { %v255_v44 = vadd.f32 %v2435_v43, %v2105_v0  ;;  %v249_v45 = vpop.f32.mrb[15].mxu0 }
 0x14a   :  { %v250_v46 = vadd.f32 %v2105_v0, %v249_v45  ;;  %2486 = vmatprep.mubr.f32.mxu1 %v270_v42 }
 0x14b   :  { %v273_v47 = vmax.f32 %v255_v44, 0.0  ;;  %2487 = vmatmul.mubr.f32.gmra.mrb[12].mxu1 %v271_v41 }
 0x14c   :  { %v272_v48 = vmax.f32 %v250_v46, 0.0 }
 0x14e   :  { %2489 = vmatprep.mubr.f32.mxu1 %v272_v48 }
 0x14f   :  { %2490 = vmatmul.mubr.f32.gmra.mrb[14].mxu1 %v273_v47 }
 0x206   :  { %v2470_v51 = vpop.f32.mrb[0].mxu1 }
 0x207   :  { %v3479_v52 = vadd.f32 %v2470_v51, %v3476_v50  ;;  %v363_v53 = vpop.f32.mrb[1].mxu1 }
 0x208   :  { %v3482_v54 = vadd.f32 %v3476_v50, %v363_v53 }
 0x209   :  { %v2108_v55 = vmul.f32 -1.442695, %v3479_v52 }
 0x20a   :  { %v2107_v56 = vmul.f32 -1.442695, %v3482_v54  ;;  %v2473_v57 = vpop.f32.mrb[2].mxu1 }
 0x20b   :  { %2918 = vpow2.f32 %v2108_v55  ;;  %v3487_v58 = vadd.f32 %v2473_v57, %v3476_v50  ;;  %v373_v59 = vpop.f32.mrb[3].mxu1 }
 0x20c   :  { %2920 = vpow2.f32 %v2107_v56  ;;  %v3490_v60 = vadd.f32 %v3476_v50, %v373_v59 }
 0x20d   :  { %v2110_v61 = vmul.f32 -1.442695, %v3487_v58 }
 0x20e   :  { %v2109_v62 = vmul.f32 -1.442695, %v3490_v60  ;;  %v2476_v63 = vpop.f32.mrb[4].mxu1 }
 0x20f   :  { %2922 = vpow2.f32 %v2110_v61  ;;  %v3495_v0 = vadd.f32 %v2476_v63, %v3476_v50  ;;  %v383_v1 = vpop.f32.mrb[5].mxu1 }
 0x210   :  { %2924 = vpow2.f32 %v2109_v62  ;;  %v3498_v2 = vadd.f32 %v3476_v50, %v383_v1 }
 0x211   :  { %v2112_v3 = vmul.f32 -1.442695, %v3495_v0 }
 0x212   :  { %v2111_v4 = vmul.f32 -1.442695, %v3498_v2  ;;  %v2479_v5 = vpop.f32.mrb[6].mxu1 }
 0x213   :  { %2926 = vpow2.f32 %v2112_v3  ;;  %v3503_v6 = vadd.f32 %v2479_v5, %v3476_v50  ;;  %v393_v7 = vpop.f32.mrb[7].mxu1 }
 0x214   :  { %2928 = vpow2.f32 %v2111_v4  ;;  %v3506_v8 = vadd.f32 %v3476_v50, %v393_v7 }
 0x215   :  { %v2919_v9 = vpop.eup %2918  ;;  %v2114_v10 = vmul.f32 -1.442695, %v3503_v6 }
 0x216   :  { %v2921_v11 = vpop.eup %2920  ;;  %v491_v12 = vadd.f32 1.0, %v2919_v9  ;;  %v2113_v13 = vmul.f32 -1.442695, %v3506_v8  ;;  %v2482_v14 = vpop.f32.mrb[8].mxu1 }
 0x217   :  { %v490_v15 = vadd.f32 1.0, %v2921_v11  ;;  %2930 = vpow2.f32 %v2114_v10  ;;  %v3511_v16 = vadd.f32 %v2482_v14, %v3476_v50  ;;  %v403_v17 = vpop.f32.mrb[9].mxu1 }
 0x218   :  { %2932 = vrcp.f32 %v491_v12  ;;  %v3514_v18 = vadd.f32 %v3476_v50, %v403_v17 }
 0x219   :  { %v2923_v19 = vpop.eup %2922  ;;  %2934 = vrcp.f32 %v490_v15  ;;  %v2116_v20 = vmul.f32 -1.442695, %v3511_v16 }
 0x21a   :  { %v2925_v21 = vpop.eup %2924  ;;  %v493_v22 = vadd.f32 1.0, %v2923_v19  ;;  %2936 = vpow2.f32 %v2113_v13  ;;  %v2115_v23 = vmul.f32 -1.442695, %v3514_v18  ;;  %v2485_v24 = vpop.f32.mrb[10].mxu1 }
 0x21b   :  { %2938 = vpow2.f32 %v2116_v20  ;;  %v3519_v25 = vadd.f32 %v2485_v24, %v3476_v50  ;;  %v413_v26 = vpop.f32.mrb[11].mxu1  ;;  %v492_v27 = vadd.f32 1.0, %v2925_v21 }
 0x21c   :  { %2940 = vrcp.f32 %v493_v22  ;;  %v3522_v28 = vadd.f32 %v3476_v50, %v413_v26 }
 0x21d   :  { %v2927_v29 = vpop.eup %2926  ;;  %v2118_v30 = vmul.f32 -1.442695, %v3519_v25  ;;  %2942 = vpow2.f32 %v2115_v23 }
 0x21e   :  { %v2929_v31 = vpop.eup %2928  ;;  %v2117_v32 = vmul.f32 -1.442695, %v3522_v28  ;;  %v2488_v33 = vpop.f32.mrb[12].mxu1  ;;  %v495_v37 = vadd.f32 1.0, %v2927_v29 }
 0x21f   :  { %v494_v34 = vadd.f32 1.0, %v2929_v31  ;;  %2944 = vpow2.f32 %v2118_v30  ;;  %v3527_v35 = vadd.f32 %v2488_v33, %v3476_v50  ;;  %v423_v36 = vpop.f32.mrb[13].mxu1 }
 0x220   :  { %2946 = vrcp.f32 %v492_v27  ;;  %v3530_v38 = vadd.f32 %v3476_v50, %v423_v36 }
 0x221   :  { %v2931_v39 = vpop.eup %2930  ;;  %2948 = vrcp.f32 %v494_v34  ;;  %v2120_v40 = vmul.f32 -1.442695, %v3527_v35 }
 0x222   :  { %v2933_v41 = vpop.eup %2932  ;;  %2950 = vpow2.f32 %v2117_v32  ;;  %v2119_v42 = vmul.f32 -1.442695, %v3530_v38  ;;  %v2491_v43 = vpop.f32.mrb[14].mxu1  ;;  %v497_v48 = vadd.f32 1.0, %v2931_v39 }
 0x223   :  { %v2935_v44 = vpop.eup %2934  ;;  %2952 = vpow2.f32 %v2120_v40  ;;  %v3535_v45 = vadd.f32 %v2491_v43, %v3476_v50  ;;  %545 = vperm.xlu0 %2916, %v2933_v41   ;;  %v433_v46 = vpop.f32.mrb[15].mxu1 }
 0x224   :  { %v2937_v47 = vpop.eup %2936  ;;  %2954 = vrcp.f32 %v495_v37  ;;  %v3538_v51 = vadd.f32 %v3476_v50, %v433_v46 }
 0x225   :  { %v2939_v53 = vpop.eup %2938  ;;  %v496_v55 = vadd.f32 1.0, %v2937_v47  ;;  %2956 = vpow2.f32 %v2119_v42  ;;  %v2122_v56 = vmul.f32 -1.442695, %v3535_v45 }
 0x226   :  { %v2941_v57 = vpop.eup %2940  ;;  %v2121_v59 = vmul.f32 -1.442695, %v3538_v51  ;;  %v499_v62 = vadd.f32 1.0, %v2939_v53 }
 0x227   :  { %2958 = vrcp.f32 %v496_v55  ;;  %555 = vperm.xlu1 %2917, %v2941_v57   ;;  %540 = vperm.xlu0 %2916, %v2935_v44   ;;  %v2943_v61 = vpop.eup %2942 }
 0x228   :  { %2960 = vrcp.f32 %v497_v48  ;;  %v498_v1 = vadd.f32 1.0, %v2943_v61 }
 0x229   :  { %v2945_v63 = vpop.eup %2944  ;;  %2962 = vpow2.f32 %v2122_v56 }
 0x22a   :  { %v2947_v3 = vpop.eup %2946  ;;  %2964 = vpow2.f32 %v2121_v59  ;;  %v501_v5 = vadd.f32 1.0, %v2945_v63 }
 0x22b   :  { %v2949_v50 = vpop.eup %2948  ;;  %2966 = vrcp.f32 %v498_v1  ;;  %550 = vperm.xlu1 %2917, %v2947_v3  }
 0x22c   :  { %v2951_v4 = vpop.eup %2950  ;;  %2968 = vrcp.f32 %v499_v62  ;;  %560 = vperm.xlu0 %2916, %v2949_v50  }
 0x22d   :  { %v2953_v7 = vpop.eup %2952  ;;  %v500_v9 = vadd.f32 1.0, %v2951_v4 }
 0x22e   :  { %v2955_v10 = vpop.eup %2954  ;;  %v503_v12 = vadd.f32 1.0, %v2953_v7 }
 0x22f   :  { %v2957_v11 = vpop.eup %2956  ;;  %2970 = vrcp.f32 %v500_v9  ;;  %565 = vperm.xlu1 %2917, %v2955_v10  }
 0x230   :  { %2972 = vrcp.f32 %v501_v5  ;;  %v502_v13 = vadd.f32 1.0, %v2957_v11 }
 0x231   :  { %v2959_v14 = vpop.eup %2958 }
 0x232   :  { %v2961_v15 = vpop.eup %2960  ;;  %2974 = vrcp.f32 %v502_v13  ;;  %570 = vperm.xlu0 %2916, %v2959_v14  }
 0x233   :  { %v2963_v17 = vpop.eup %2962  ;;  %575 = vperm.xlu1 %2917, %v2961_v15   ;;  %2976 = vrcp.f32 %v503_v12 }
 0x234   :  { %v2965_v19 = vpop.eup %2964  ;;  %v505_v20 = vadd.f32 1.0, %v2963_v17 }
 0x235   :  { %v2967_v21 = vpop.eup %2966  ;;  %v504_v22 = vadd.f32 1.0, %v2965_v19 }
 0x236   :  { %v2969_v23 = vpop.eup %2968  ;;  %580 = vperm.xlu0 %2916, %v2967_v21  }
 0x237   :  { %2978 = vrcp.f32 %v504_v22  ;;  %585 = vperm.xlu1 %2917, %v2969_v23  }
 0x238   :  { %2980 = vrcp.f32 %v505_v20 }
 0x239   :  { %v2971_v24 = vpop.eup %2970 }
 0x23a   :  { %v2973_v26 = vpop.eup %2972  ;;  %590 = vperm.xlu0 %2916, %v2971_v24  }
 0x23b   :  { %595 = vperm.xlu1 %2917, %v2973_v26  }
 0x23c   :  { %v2975_v27 = vpop.eup %2974 }
 0x23d   :  { %v2977_v29 = vpop.eup %2976 }
 0x23e   :  { %600 = vperm.xlu0 %2916, %v2975_v27  }
 0x23f   :  { %605 = vperm.xlu1 %2917, %v2977_v29  }
 0x241   :  { %v2979_v30 = vpop.eup %2978 }
 0x242   :  { %v2981_v31 = vpop.eup %2980  ;;  %610 = vperm.xlu0 %2916, %v2979_v30  }
 0x243   :  { %615 = vperm.xlu1 %2917, %v2981_v31  }
 0x244   :  { %3330 = shalt.err (!%p3327_p12)  }
 0x245   :  { %s3331_s1 = scalar_lea.vmem %s71_s13, 2048  ;;  %p3336_p0 = scmp.lt.s32.totalorder %s71_s13, %s71_s13 }
 0x246   :  { %p3332_p13 = scmp.ne.s32.totalorder %s71_s13, %s3331_s1  ;;  %p3337_p1 = scmp.lt.s32.totalorder %s3331_s1, %s3331_s1 }
 0x248   :  { %p3338_p2 = por %p3337_p1, %p3336_p0 }
 0x24a   :  { %p3339_p3 = pnand %p3338_p2, %p3332_p13 }
 0x24c   :  { %3342 = shalt.err (!%p3339_p3)  }
 0x24d   :  { %73 = dma.hbm_to_vmem [thread:$0]  %s4179_s5, 2048, %s71_s13, [#allocation3]  ;;  %v2780_v13 = vpack.c.bf16 %v3479_v52, %v3482_v54  ;;  %v2784_v14 = vpack.c.bf16 %v3487_v58, %v3490_v60 }
 0x2a2   :  { %v546_v32 = vpop.permute.xlu0 %545 }
 0x2a3   :  { %v3555_v33 = vmul.f32 %v546_v32, %v3479_v52 }
 0x2a6   :  { %v556_v34 = vpop.permute.xlu1 %555  ;;  %v541_v36 = vpop.permute.xlu0 %540 }
 0x2a7   :  { %v3558_v37 = vmul.f32 %v556_v34, %v3487_v58  ;;  %v3561_v39 = vmul.f32 %v541_v36, %v3482_v54 }
 0x2aa   :  { %v551_v40 = vpop.permute.xlu1 %550 }
 0x2ab   :  { %v3564_v41 = vmul.f32 %v551_v40, %v3490_v60  ;;  %v561_v42 = vpop.permute.xlu0 %560 }
 0x2ac   :  { %v3567_v43 = vmul.f32 %v561_v42, %v3498_v2 }
 0x2ae   :  { %v566_v44 = vpop.permute.xlu1 %565 }
 0x2af   :  { %v3570_v46 = vmul.f32 %v566_v44, %v3495_v0 }
 0x2b1   :  { %v571_v47 = vpop.permute.xlu0 %570 }
 0x2b2   :  { %v3573_v48 = vmul.f32 %v571_v47, %v3506_v8  ;;  %v576_v53 = vpop.permute.xlu1 %575 }
 0x2b3   :  { %v3576_v55 = vmul.f32 %v576_v53, %v3503_v6 }
 0x2b5   :  { %v581_v56 = vpop.permute.xlu0 %580 }
 0x2b6   :  { %v3579_v57 = vmul.f32 %v581_v56, %v3514_v18  ;;  %v586_v59 = vpop.permute.xlu1 %585 }
 0x2b7   :  { %v3582_v61 = vmul.f32 %v586_v59, %v3511_v16 }
 0x2b9   :  { %v591_v62 = vpop.permute.xlu0 %590 }
 0x2ba   :  { %v3585_v63 = vmul.f32 %v591_v62, %v3522_v28  ;;  %v596_v1 = vpop.permute.xlu1 %595 }
 0x2bb   :  { %v3588_v3 = vmul.f32 %v596_v1, %v3519_v25 }
 0x2bc   :  { %4186 = vst [vmem:[#allocation19_spill] sm:$0xff] %v3585_v63 }
 0x2bd   :  { %v601_v50 = vpop.permute.xlu0 %600 }
 0x2be   :  { %v3591_v4 = vmul.f32 %v601_v50, %v3530_v38  ;;  %v606_v5 = vpop.permute.xlu1 %605 }
 0x2bf   :  { %v3594_v7 = vmul.f32 %v606_v5, %v3527_v35 }
 0x2c0   :  { %4187 = vst [vmem:[#allocation20_spill] sm:$0xff] %v3591_v4 }
 0x2c1   :  { %4188 = vst [vmem:[#allocation21_spill] sm:$0xff] %v3594_v7  ;;  %v611_v9 = vpop.permute.xlu0 %610 }
 0x2c2   :  { %v3597_v10 = vmul.f32 %v611_v9, %v3538_v51  ;;  %v616_v11 = vpop.permute.xlu1 %615 }
 0x2c3   :  { %v3600_v12 = vmul.f32 %v616_v11, %v3535_v45 }
 0x2c4   :  { %4189 = vst [vmem:[#allocation22_spill] sm:$0xff] %v3597_v10 }
 0x2c5   :  { %4190 = vst [vmem:[#allocation23_spill] sm:$0xff] %v3600_v12 }
 0x2c6   :  { %3369 = dma.done.wait [#allocation3], 2048 }
 0x2c7   :  { %3370 = vsyncadd [#allocation3], 4294965248  ;;  %2982 = vset.pattern.permute.xlu0 %v3378_v49  ;;  %2983 = vset.pattern.permute.xlu1 %v3378_v49  ;;  %v2788_v15 = vpack.c.bf16 %v3495_v0, %v3498_v2  ;;  %v3610_v17 = vld [vmem:[#allocation2] sm:$0xff]  ;;  %v2792_v52 = vpack.c.bf16 %v3503_v6, %v3506_v8  ;;  %v2796_v49 = vpack.c.bf16 %v3511_v16, %v3514_v18  ;;  %v3624_v0 = vld [vmem:[#allocation2 + $0x8] sm:$0xff]  ;;  %s3380_s5 = smov [#allocation10]  }
 0x2c8   :  { %2781 = vmatprep.subr.bf16.mxu0 %v2780_v13  ;;  %2524 = vmatprep.mubr.f32.mxu0 %v3610_v17  ;;  %v2800_v54 = vpack.c.bf16 %v3519_v25, %v3522_v28  ;;  %v2804_v58 = vpack.c.bf16 %v3527_v35, %v3530_v38  ;;  %v2808_v60 = vpack.c.bf16 %v3535_v45, %v3538_v51  ;;  %v3626_v2 = vld [vmem:[#allocation2 + $0x10] sm:$0xff]  ;;  %v3630_v6 = vld [vmem:[#allocation2 + $0x18] sm:$0xff]  ;;  %v3632_v8 = vld [vmem:[#allocation2 + $0x20] sm:$0xff]  ;;  %s2086_s23 = sshll.u32 %s3380_s5, 4  ;;  %s2087_s23 = int_to_ptr.vmem [resolvable:$true] %s2086_s23 }
 0x2c9   :  { %2783 = vmatpush3.bf16.msra.mxu0 %v2780_v13  ;;  %2580 = vmatprep.mubr.f32.mxu1 %v3610_v17  ;;  %v3636_v16 = vld [vmem:[#allocation2 + $0x28] sm:$0xff]  ;;  %v3638_v18 = vld [vmem:[#allocation2 + $0x30] sm:$0xff]  ;;  %v3642_v25 = vld [vmem:[#allocation2 + $0x38] sm:$0xff]  ;;  %s3343_s25 = scalar_lea.vmem %s2087_s23, 2048  ;;  %p3348_p5 = scmp.lt.s32.totalorder %s2087_s23, %s2087_s23 }
 0x2ca   :  { %2785 = vmatprep.subr.bf16.mxu0 %v2784_v14  ;;  %v3644_v28 = vld [vmem:[#allocation2 + $0x40] sm:$0xff]  ;;  %v3648_v35 = vld [vmem:[#allocation2 + $0x48] sm:$0xff]  ;;  %v3650_v38 = vld [vmem:[#allocation2 + $0x50] sm:$0xff]  ;;  %p3344_p4 = scmp.ne.s32.totalorder %s2087_s23, %s3343_s25  ;;  %p3349_p6 = scmp.lt.s32.totalorder %s3343_s25, %s3343_s25 }
 0x2cb   :  { %v3654_v45 = vld [vmem:[#allocation2 + $0x58] sm:$0xff]  ;;  %v3656_v51 = vld [vmem:[#allocation2 + $0x60] sm:$0xff]  ;;  %v3660_v19 = vld [vmem:[#allocation2 + $0x68] sm:$0xff] }
 0x2cc   :  { %v3662_v20 = vld [vmem:[#allocation2 + $0x70] sm:$0xff]  ;;  %v3666_v21 = vld [vmem:[#allocation2 + $0x78] sm:$0xff]  ;;  %p3350_p7 = por %p3349_p6, %p3348_p5 }
 0x2cd   :  { %2787 = vmatpush3.bf16.msra.mxu0 %v2784_v14 }
 0x2ce   :  { %2789 = vmatprep.subr.bf16.mxu0 %v2788_v15  ;;  %p3351_p8 = pnand %p3350_p7, %p3344_p4 }
 0x2d1   :  { %2791 = vmatpush3.bf16.msra.mxu0 %v2788_v15 }
 0x2d2   :  { %2793 = vmatprep.subr.bf16.mxu0 %v2792_v52 }
 0x2d5   :  { %2795 = vmatpush3.bf16.msra.mxu0 %v2792_v52 }
 0x2d6   :  { %2797 = vmatprep.subr.bf16.mxu0 %v2796_v49 }
 0x2d9   :  { %2799 = vmatpush3.bf16.msra.mxu0 %v2796_v49 }
 0x2da   :  { %2801 = vmatprep.subr.bf16.mxu0 %v2800_v54 }
 0x2dd   :  { %2803 = vmatpush3.bf16.msra.mxu0 %v2800_v54 }
 0x2de   :  { %2805 = vmatprep.subr.bf16.mxu0 %v2804_v58 }
 0x2e1   :  { %2807 = vmatpush3.bf16.msra.mxu0 %v2804_v58 }
 0x2e2   :  { %2809 = vmatprep.subr.bf16.mxu0 %v2808_v60 }
 0x2e5   :  { %2811 = vmatpush3.bf16.msra.mxu0 %v2808_v60 }
 0x2e8   :  { %2525 = vmatmul.mubr.f32.vlgmr.msra.gmra.mrb[16].mxu0 %v3624_v0 }
 0x2e9   :  { %2527 = vmatprep.mubr.f32.mxu0 %v3626_v2 }
 0x2ec   :  { %2528 = vmatmul.mubr.f32.gmra.mrb[18].mxu0 %v3630_v6 }
 0x2ed   :  { %2530 = vmatprep.mubr.f32.mxu0 %v3632_v8 }
 0x2f0   :  { %2531 = vmatmul.mubr.f32.gmra.mrb[20].mxu0 %v3636_v16 }
 0x2f1   :  { %2533 = vmatprep.mubr.f32.mxu0 %v3638_v18 }
 0x2f4   :  { %2534 = vmatmul.mubr.f32.gmra.mrb[22].mxu0 %v3642_v25 }
 0x2f5   :  { %2536 = vmatprep.mubr.f32.mxu0 %v3644_v28 }
 0x2f8   :  { %2537 = vmatmul.mubr.f32.gmra.mrb[24].mxu0 %v3648_v35 }
 0x2f9   :  { %2539 = vmatprep.mubr.f32.mxu0 %v3650_v38 }
 0x2fc   :  { %2540 = vmatmul.mubr.f32.gmra.mrb[26].mxu0 %v3654_v45 }
 0x2fd   :  { %2542 = vmatprep.mubr.f32.mxu0 %v3656_v51 }
 0x300   :  { %2543 = vmatmul.mubr.f32.gmra.mrb[28].mxu0 %v3660_v19 }
 0x301   :  { %2545 = vmatprep.mubr.f32.mxu0 %v3662_v20 }
 0x304   :  { %2546 = vmatmul.mubr.f32.gmra.mrb[30].mxu0 %v3666_v21 }
 0x305   :  { %2636 = vmatprep.mubr.f32.mxu0 %v3610_v17 }
 0x3bb   :  { %v3670_v22 = vpop.f32.mrb[16].mxu0 }
 0x3bc   :  { %v2124_v23 = vmul.f32 -1.442695, %v3670_v22  ;;  %v3673_v24 = vpop.f32.mrb[17].mxu0 }
 0x3bd   :  { %v2123_v26 = vmul.f32 -1.442695, %v3673_v24  ;;  %v2812_v27 = vpack.c.bf16 %v3670_v22, %v3673_v24 }
 0x3be   :  { %2984 = vpow2.f32 %v2124_v23 }
 0x3bf   :  { %2986 = vpow2.f32 %v2123_v26  ;;  %v3678_v29 = vpop.f32.mrb[18].mxu0  ;;  %2813 = vmatprep.subr.bf16.mxu1 %v2812_v27 }
 0x3c0   :  { %v2126_v30 = vmul.f32 -1.442695, %v3678_v29  ;;  %v3681_v31 = vpop.f32.mrb[19].mxu0  ;;  %2815 = vmatpush3.bf16.msra.mxu1 %v2812_v27 }
 0x3c1   :  { %v2125_v32 = vmul.f32 -1.442695, %v3681_v31  ;;  %v2816_v34 = vpack.c.bf16 %v3678_v29, %v3681_v31 }
 0x3c2   :  { %2988 = vpow2.f32 %v2126_v30 }
 0x3c3   :  { %2990 = vpow2.f32 %v2125_v32  ;;  %v3686_v36 = vpop.f32.mrb[20].mxu0  ;;  %2817 = vmatprep.subr.bf16.mxu1 %v2816_v34 }
 0x3c4   :  { %v2128_v40 = vmul.f32 -1.442695, %v3686_v36  ;;  %v3689_v42 = vpop.f32.mrb[21].mxu0  ;;  %2819 = vmatpush3.bf16.msra.mxu1 %v2816_v34 }
 0x3c5   :  { %v2127_v44 = vmul.f32 -1.442695, %v3689_v42  ;;  %v2820_v47 = vpack.c.bf16 %v3686_v36, %v3689_v42 }
 0x3c6   :  { %2992 = vpow2.f32 %v2128_v40 }
 0x3c7   :  { %2994 = vpow2.f32 %v2127_v44  ;;  %v3694_v53 = vpop.f32.mrb[22].mxu0  ;;  %2821 = vmatprep.subr.bf16.mxu1 %v2820_v47 }
 0x3c8   :  { %v2985_v56 = vpop.eup %2984  ;;  %v2130_v59 = vmul.f32 -1.442695, %v3694_v53  ;;  %v3697_v62 = vpop.f32.mrb[23].mxu0  ;;  %2823 = vmatpush3.bf16.msra.mxu1 %v2820_v47 }
 0x3c9   :  { %v2987_v1 = vpop.eup %2986  ;;  %v847_v50 = vadd.f32 1.0, %v2985_v56  ;;  %v2129_v5 = vmul.f32 -1.442695, %v3697_v62  ;;  %v2824_v9 = vpack.c.bf16 %v3694_v53, %v3697_v62 }
 0x3ca   :  { %v846_v11 = vadd.f32 1.0, %v2987_v1  ;;  %2996 = vpow2.f32 %v2130_v59 }
 0x3cb   :  { %2998 = vrcp.f32 %v847_v50  ;;  %v3702_v13 = vpop.f32.mrb[24].mxu0  ;;  %2825 = vmatprep.subr.bf16.mxu1 %v2824_v9 }
 0x3cc   :  { %v2989_v14 = vpop.eup %2988  ;;  %3000 = vrcp.f32 %v846_v11  ;;  %v2132_v15 = vmul.f32 -1.442695, %v3702_v13  ;;  %v3705_v52 = vpop.f32.mrb[25].mxu0  ;;  %2827 = vmatpush3.bf16.msra.mxu1 %v2824_v9 }
 0x3cd   :  { %v2991_v49 = vpop.eup %2990  ;;  %v849_v54 = vadd.f32 1.0, %v2989_v14  ;;  %3002 = vpow2.f32 %v2129_v5  ;;  %v2131_v58 = vmul.f32 -1.442695, %v3705_v52  ;;  %v2828_v60 = vpack.c.bf16 %v3702_v13, %v3705_v52 }
 0x3ce   :  { %3004 = vpow2.f32 %v2132_v15  ;;  %v848_v23 = vadd.f32 1.0, %v2991_v49 }
 0x3cf   :  { %3006 = vrcp.f32 %v849_v54  ;;  %v3710_v26 = vpop.f32.mrb[26].mxu0  ;;  %2829 = vmatprep.subr.bf16.mxu1 %v2828_v60 }
 0x3d0   :  { %v2993_v27 = vpop.eup %2992  ;;  %v2134_v30 = vmul.f32 -1.442695, %v3710_v26  ;;  %v3713_v32 = vpop.f32.mrb[27].mxu0  ;;  %2831 = vmatpush3.bf16.msra.mxu1 %v2828_v60  ;;  %3008 = vpow2.f32 %v2131_v58 }
 0x3d1   :  { %v2995_v34 = vpop.eup %2994  ;;  %v2133_v40 = vmul.f32 -1.442695, %v3713_v32  ;;  %v2832_v44 = vpack.c.bf16 %v3710_v26, %v3713_v32  ;;  %v851_v56 = vadd.f32 1.0, %v2993_v27 }
 0x3d2   :  { %v850_v47 = vadd.f32 1.0, %v2995_v34  ;;  %3010 = vpow2.f32 %v2134_v30 }
 0x3d3   :  { %3012 = vrcp.f32 %v848_v23  ;;  %v3718_v59 = vpop.f32.mrb[28].mxu0  ;;  %2833 = vmatprep.subr.bf16.mxu1 %v2832_v44 }
 0x3d4   :  { %v2997_v1 = vpop.eup %2996  ;;  %3014 = vrcp.f32 %v850_v47  ;;  %v2136_v50 = vmul.f32 -1.442695, %v3718_v59  ;;  %v3721_v5 = vpop.f32.mrb[29].mxu0  ;;  %2835 = vmatpush3.bf16.msra.mxu1 %v2832_v44 }
 0x3d5   :  { %v2999_v9 = vpop.eup %2998  ;;  %3016 = vpow2.f32 %v2133_v40  ;;  %v2135_v11 = vmul.f32 -1.442695, %v3721_v5  ;;  %v2836_v14 = vpack.c.bf16 %v3718_v59, %v3721_v5  ;;  %v853_v54 = vadd.f32 1.0, %v2997_v1 }
 0x3d6   :  { %v3001_v15 = vpop.eup %3000  ;;  %3018 = vpow2.f32 %v2136_v50  ;;  %901 = vperm.xlu0 %2982, %v2999_v9  }
 0x3d7   :  { %v3003_v49 = vpop.eup %3002  ;;  %3020 = vrcp.f32 %v851_v56  ;;  %v3726_v58 = vpop.f32.mrb[30].mxu0  ;;  %2837 = vmatprep.subr.bf16.mxu1 %v2836_v14 }
 0x3d8   :  { %4191 = vst [vmem:[#allocation24_spill] sm:$0xff] %v3726_v58  ;;  %v3005_v60 = vpop.eup %3004  ;;  %v852_v23 = vadd.f32 1.0, %v3003_v49  ;;  %3022 = vpow2.f32 %v2135_v11  ;;  %v2138_v27 = vmul.f32 -1.442695, %v3726_v58  ;;  %v3729_v30 = vpop.f32.mrb[31].mxu0  ;;  %2839 = vmatpush3.bf16.msra.mxu1 %v2836_v14 }
 0x3d9   :  { %4192 = vst [vmem:[#allocation25_spill] sm:$0xff] %v3729_v30  ;;  %v3007_v34 = vpop.eup %3006  ;;  %v2137_v40 = vmul.f32 -1.442695, %v3729_v30  ;;  %v2840_v44 = vpack.c.bf16 %v3726_v58, %v3729_v30  ;;  %v855_v56 = vadd.f32 1.0, %v3005_v60 }
 0x3da   :  { %3024 = vrcp.f32 %v852_v23  ;;  %896 = vperm.xlu0 %2982, %v3001_v15   ;;  %911 = vperm.xlu1 %2983, %v3007_v34   ;;  %v3009_v47 = vpop.eup %3008 }
 0x3db   :  { %3026 = vrcp.f32 %v853_v54  ;;  %2841 = vmatprep.subr.bf16.mxu1 %v2840_v44  ;;  %v854_v50 = vadd.f32 1.0, %v3009_v47 }
 0x3dc   :  { %v3011_v1 = vpop.eup %3010  ;;  %3028 = vpow2.f32 %v2138_v27  ;;  %2843 = vmatpush3.bf16.msra.mxu1 %v2840_v44 }
 0x3dd   :  { %v3013_v9 = vpop.eup %3012  ;;  %3030 = vpow2.f32 %v2137_v40  ;;  %v857_v49 = vadd.f32 1.0, %v3011_v1 }
 0x3de   :  { %v3015_v11 = vpop.eup %3014  ;;  %3032 = vrcp.f32 %v854_v50  ;;  %906 = vperm.xlu1 %2983, %v3013_v9  }
 0x3df   :  { %v3017_v14 = vpop.eup %3016  ;;  %3034 = vrcp.f32 %v855_v56  ;;  %916 = vperm.xlu0 %2982, %v3015_v11   ;;  %2581 = vmatmul.mubr.f32.vlgmr.msra.gmra.mrb[16].mxu1 %v3624_v0 }
 0x3e0   :  { %v3019_v15 = vpop.eup %3018  ;;  %v856_v23 = vadd.f32 1.0, %v3017_v14  ;;  %2583 = vmatprep.mubr.f32.mxu1 %v3626_v2 }
 0x3e1   :  { %v3021_v54 = vpop.eup %3020  ;;  %v859_v27 = vadd.f32 1.0, %v3019_v15 }
 0x3e2   :  { %v3023_v60 = vpop.eup %3022  ;;  %3036 = vrcp.f32 %v856_v23  ;;  %921 = vperm.xlu1 %2983, %v3021_v54  }
 0x3e3   :  { %3038 = vrcp.f32 %v857_v49  ;;  %v858_v34 = vadd.f32 1.0, %v3023_v60  ;;  %2584 = vmatmul.mubr.f32.gmra.mrb[18].mxu1 %v3630_v6 }
 0x3e4   :  { %v3025_v40 = vpop.eup %3024  ;;  %2586 = vmatprep.mubr.f32.mxu1 %v3632_v8 }
 0x3e5   :  { %v3027_v44 = vpop.eup %3026  ;;  %3040 = vrcp.f32 %v858_v34  ;;  %926 = vperm.xlu0 %2982, %v3025_v40  }
 0x3e6   :  { %v3029_v47 = vpop.eup %3028  ;;  %931 = vperm.xlu1 %2983, %v3027_v44   ;;  %3042 = vrcp.f32 %v859_v27 }
 0x3e7   :  { %v3031_v56 = vpop.eup %3030  ;;  %v861_v1 = vadd.f32 1.0, %v3029_v47  ;;  %2587 = vmatmul.mubr.f32.gmra.mrb[20].mxu1 %v3636_v16 }
 0x3e8   :  { %v3033_v50 = vpop.eup %3032  ;;  %v860_v9 = vadd.f32 1.0, %v3031_v56  ;;  %2589 = vmatprep.mubr.f32.mxu1 %v3638_v18 }
 0x3e9   :  { %v3035_v11 = vpop.eup %3034  ;;  %936 = vperm.xlu0 %2982, %v3033_v50  }
 0x3ea   :  { %3044 = vrcp.f32 %v860_v9  ;;  %941 = vperm.xlu1 %2983, %v3035_v11  }
 0x3eb   :  { %3046 = vrcp.f32 %v861_v1  ;;  %2590 = vmatmul.mubr.f32.gmra.mrb[22].mxu1 %v3642_v25 }
 0x3ec   :  { %v3037_v14 = vpop.eup %3036  ;;  %2592 = vmatprep.mubr.f32.mxu1 %v3644_v28 }
 0x3ed   :  { %v3039_v49 = vpop.eup %3038  ;;  %946 = vperm.xlu0 %2982, %v3037_v14  }
 0x3ee   :  { %951 = vperm.xlu1 %2983, %v3039_v49  }
 0x3ef   :  { %v3041_v15 = vpop.eup %3040  ;;  %2593 = vmatmul.mubr.f32.gmra.mrb[24].mxu1 %v3648_v35 }
 0x3f0   :  { %2595 = vmatprep.mubr.f32.mxu1 %v3650_v38  ;;  %v3043_v23 = vpop.eup %3042 }
 0x3f1   :  { %956 = vperm.xlu0 %2982, %v3041_v15  }
 0x3f2   :  { %961 = vperm.xlu1 %2983, %v3043_v23  }
 0x3f3   :  { %2596 = vmatmul.mubr.f32.gmra.mrb[26].mxu1 %v3654_v45 }
 0x3f4   :  { %v3045_v54 = vpop.eup %3044  ;;  %2598 = vmatprep.mubr.f32.mxu1 %v3656_v51 }
 0x3f5   :  { %v3047_v60 = vpop.eup %3046  ;;  %966 = vperm.xlu0 %2982, %v3045_v54  }
 0x3f6   :  { %971 = vperm.xlu1 %2983, %v3047_v60  }
 0x3f7   :  { %2599 = vmatmul.mubr.f32.gmra.mrb[28].mxu1 %v3660_v19 }
 0x3f8   :  { %2601 = vmatprep.mubr.f32.mxu1 %v3662_v20 }
 0x3fb   :  { %2602 = vmatmul.mubr.f32.gmra.mrb[30].mxu1 %v3666_v21 }
 0x3fc   :  { %2692 = vmatprep.mubr.f32.mxu1 %v3610_v17 }
 0x455   :  { %v902_v27 = vpop.permute.xlu0 %901 }
 0x456   :  { %v3751_v34 = vmul.f32 %v3670_v22, %v902_v27 }
 0x459   :  { %v897_v40 = vpop.permute.xlu0 %896  ;;  %v912_v44 = vpop.permute.xlu1 %911 }
 0x45a   :  { %v3754_v47 = vmul.f32 %v897_v40, %v3673_v24  ;;  %v3757_v56 = vmul.f32 %v3678_v29, %v912_v44 }
 0x45d   :  { %v907_v1 = vpop.permute.xlu1 %906 }
 0x45e   :  { %v3760_v50 = vmul.f32 %v907_v1, %v3681_v31  ;;  %v917_v9 = vpop.permute.xlu0 %916 }
 0x45f   :  { %v3763_v11 = vmul.f32 %v917_v9, %v3689_v42 }
 0x461   :  { %v922_v17 = vpop.permute.xlu1 %921 }
 0x462   :  { %v3766_v22 = vmul.f32 %v3686_v36, %v922_v17 }
 0x464   :  { %v927_v14 = vpop.permute.xlu0 %926 }
 0x465   :  { %v3769_v49 = vmul.f32 %v927_v14, %v3697_v62  ;;  %v932_v24 = vpop.permute.xlu1 %931 }
 0x466   :  { %v3772_v29 = vmul.f32 %v3694_v53, %v932_v24 }
 0x468   :  { %v937_v15 = vpop.permute.xlu0 %936 }
 0x469   :  { %v3775_v31 = vmul.f32 %v937_v15, %v3705_v52  ;;  %v942_v23 = vpop.permute.xlu1 %941 }
 0x46a   :  { %v3778_v42 = vmul.f32 %v3702_v13, %v942_v23 }
 0x46c   :  { %v947_v54 = vpop.permute.xlu0 %946 }
 0x46d   :  { %v3781_v36 = vmul.f32 %v947_v54, %v3713_v32  ;;  %v952_v60 = vpop.permute.xlu1 %951 }
 0x46e   :  { %v3784_v62 = vmul.f32 %v3710_v26, %v952_v60 }
 0x46f   :  { %4193 = vst [vmem:[#allocation26_spill] sm:$0xff] %v3781_v36 }
 0x470   :  { %v957_v27 = vpop.permute.xlu0 %956 }
 0x471   :  { %v3787_v53 = vmul.f32 %v957_v27, %v3721_v5  ;;  %v962_v40 = vpop.permute.xlu1 %961 }
 0x472   :  { %v3790_v52 = vmul.f32 %v3718_v59, %v962_v40 }
 0x473   :  { %4194 = vst [vmem:[#allocation27_spill] sm:$0xff] %v3787_v53 }
 0x474   :  { %4195 = vst [vmem:[#allocation28_spill] sm:$0xff] %v3790_v52 }
 0x4b2   :  { %v3792_v44 = vpop.f32.mrb[16].mxu1 }
 0x4b3   :  { %v2140_v13 = vmul.f32 -1.442695, %v3792_v44  ;;  %v3795_v1 = vpop.f32.mrb[17].mxu1 }
 0x4b4   :  { %v2139_v32 = vmul.f32 -1.442695, %v3795_v1  ;;  %v2844_v26 = vpack.c.bf16 %v3792_v44, %v3795_v1 }
 0x4b5   :  { %3048 = vpow2.f32 %v2140_v13 }
 0x4b6   :  { %3050 = vpow2.f32 %v2139_v32  ;;  %v3800_v9 = vpop.f32.mrb[18].mxu1  ;;  %2845 = vmatprep.subr.bf16.mxu0 %v2844_v26 }
 0x4b7   :  { %v2142_v5 = vmul.f32 -1.442695, %v3800_v9  ;;  %v3803_v59 = vpop.f32.mrb[19].mxu1  ;;  %2847 = vmatpush3.bf16.msra.mxu0 %v2844_v26 }
 0x4b8   :  { %v2141_v17 = vmul.f32 -1.442695, %v3803_v59  ;;  %v2848_v14 = vpack.c.bf16 %v3800_v9, %v3803_v59 }
 0x4b9   :  { %3052 = vpow2.f32 %v2142_v5 }
 0x4ba   :  { %3054 = vpow2.f32 %v2141_v17  ;;  %v3808_v24 = vpop.f32.mrb[20].mxu1  ;;  %2849 = vmatprep.subr.bf16.mxu0 %v2848_v14 }
 0x4bb   :  { %v2144_v15 = vmul.f32 -1.442695, %v3808_v24  ;;  %v3811_v23 = vpop.f32.mrb[21].mxu1  ;;  %2851 = vmatpush3.bf16.msra.mxu0 %v2848_v14 }
 0x4bc   :  { %v2143_v54 = vmul.f32 -1.442695, %v3811_v23  ;;  %v2852_v60 = vpack.c.bf16 %v3808_v24, %v3811_v23 }
 0x4bd   :  { %3056 = vpow2.f32 %v2144_v15 }
 0x4be   :  { %3058 = vpow2.f32 %v2143_v54  ;;  %v3816_v27 = vpop.f32.mrb[22].mxu1  ;;  %2853 = vmatprep.subr.bf16.mxu0 %v2852_v60 }
 0x4bf   :  { %v3049_v40 = vpop.eup %3048  ;;  %v2146_v13 = vmul.f32 -1.442695, %v3816_v27  ;;  %v3819_v32 = vpop.f32.mrb[23].mxu1  ;;  %2855 = vmatpush3.bf16.msra.mxu0 %v2852_v60 }
 0x4c0   :  { %v3051_v26 = vpop.eup %3050  ;;  %v1200_v5 = vadd.f32 1.0, %v3049_v40  ;;  %v2145_v17 = vmul.f32 -1.442695, %v3819_v32  ;;  %v2856_v14 = vpack.c.bf16 %v3816_v27, %v3819_v32 }
 0x4c1   :  { %v1199_v10 = vadd.f32 1.0, %v3051_v26  ;;  %3060 = vpow2.f32 %v2146_v13 }
 0x4c2   :  { %3062 = vrcp.f32 %v1200_v5  ;;  %v3824_v15 = vpop.f32.mrb[24].mxu1  ;;  %2857 = vmatprep.subr.bf16.mxu0 %v2856_v14 }
 0x4c3   :  { %v3053_v54 = vpop.eup %3052  ;;  %3064 = vrcp.f32 %v1199_v10  ;;  %v2148_v12 = vmul.f32 -1.442695, %v3824_v15  ;;  %v3827_v30 = vpop.f32.mrb[25].mxu1  ;;  %2859 = vmatpush3.bf16.msra.mxu0 %v2856_v14 }
 0x4c4   :  { %v3055_v60 = vpop.eup %3054  ;;  %v1202_v40 = vadd.f32 1.0, %v3053_v54  ;;  %3066 = vpow2.f32 %v2145_v17  ;;  %v2147_v53 = vmul.f32 -1.442695, %v3827_v30  ;;  %v2860_v26 = vpack.c.bf16 %v3824_v15, %v3827_v30 }
 0x4c5   :  { %v1201_v13 = vadd.f32 1.0, %v3055_v60  ;;  %3068 = vpow2.f32 %v2148_v12 }
 0x4c6   :  { %3070 = vrcp.f32 %v1202_v40  ;;  %v3832_v5 = vpop.f32.mrb[26].mxu1  ;;  %2861 = vmatprep.subr.bf16.mxu0 %v2860_v26 }
 0x4c7   :  { %v3057_v10 = vpop.eup %3056  ;;  %3072 = vrcp.f32 %v1201_v13  ;;  %v2150_v4 = vmul.f32 -1.442695, %v3832_v5  ;;  %v3835_v58 = vpop.f32.mrb[27].mxu1  ;;  %2863 = vmatpush3.bf16.msra.mxu0 %v2860_v26 }
 0x4c8   :  { %4196 = vst [vmem:[#allocation29_spill] sm:$0xff] %v3835_v58  ;;  %v3059_v14 = vpop.eup %3058  ;;  %v1204_v17 = vadd.f32 1.0, %v3057_v10  ;;  %3074 = vpow2.f32 %v2147_v53  ;;  %v2149_v54 = vmul.f32 -1.442695, %v3835_v58  ;;  %v2864_v60 = vpack.c.bf16 %v3832_v5, %v3835_v58 }
 0x4c9   :  { %v1203_v12 = vadd.f32 1.0, %v3059_v14  ;;  %3076 = vpow2.f32 %v2150_v4 }
 0x4ca   :  { %3078 = vrcp.f32 %v1204_v17  ;;  %v3840_v40 = vpop.f32.mrb[28].mxu1  ;;  %2865 = vmatprep.subr.bf16.mxu0 %v2864_v60 }
 0x4cb   :  { %4197 = vst [vmem:[#allocation30_spill] sm:$0xff] %v3840_v40  ;;  %v3061_v13 = vpop.eup %3060  ;;  %3080 = vrcp.f32 %v1203_v12  ;;  %v2152_v52 = vmul.f32 -1.442695, %v3840_v40  ;;  %v3843_v7 = vpop.f32.mrb[29].mxu1  ;;  %2867 = vmatpush3.bf16.msra.mxu0 %v2864_v60 }
 0x4cc   :  { %4198 = vst [vmem:[#allocation31_spill] sm:$0xff] %v3843_v7  ;;  %v3063_v26 = vpop.eup %3062  ;;  %v1206_v53 = vadd.f32 1.0, %v3061_v13  ;;  %3082 = vpow2.f32 %v2149_v54  ;;  %v2151_v10 = vmul.f32 -1.442695, %v3843_v7  ;;  %v2868_v14 = vpack.c.bf16 %v3840_v40, %v3843_v7 }
 0x4cd   :  { %v3065_v4 = vpop.eup %3064  ;;  %3084 = vpow2.f32 %v2152_v52  ;;  %1254 = vperm.xlu1 %2983, %v3063_v26  }
 0x4ce   :  { %v3067_v17 = vpop.eup %3066  ;;  %3086 = vrcp.f32 %v1206_v53  ;;  %v3848_v58 = vpop.f32.mrb[30].mxu1  ;;  %2869 = vmatprep.subr.bf16.mxu0 %v2868_v14  ;;  %1249 = vperm.xlu0 %2982, %v3065_v4  }
 0x4cf   :  { %v3069_v12 = vpop.eup %3068  ;;  %v1205_v36 = vadd.f32 1.0, %v3067_v17  ;;  %3088 = vpow2.f32 %v2151_v10  ;;  %v2154_v60 = vmul.f32 -1.442695, %v3848_v58  ;;  %v3851_v54 = vpop.f32.mrb[31].mxu1  ;;  %2871 = vmatpush3.bf16.msra.mxu0 %v2868_v14 }
 0x4d0   :  { %v3071_v13 = vpop.eup %3070  ;;  %v1208_v63 = vadd.f32 1.0, %v3069_v12  ;;  %v2153_v7 = vmul.f32 -1.442695, %v3851_v54  ;;  %v2872_v52 = vpack.c.bf16 %v3848_v58, %v3851_v54 }
 0x4d1   :  { %v3073_v26 = vpop.eup %3072  ;;  %3090 = vrcp.f32 %v1205_v36  ;;  %1264 = vperm.xlu1 %2983, %v3071_v13  }
 0x4d2   :  { %v3075_v53 = vpop.eup %3074  ;;  %3092 = vrcp.f32 %v1208_v63  ;;  %2873 = vmatprep.subr.bf16.mxu0 %v2872_v52  ;;  %1259 = vperm.xlu0 %2982, %v3073_v26  }
 0x4d3   :  { %v3077_v10 = vpop.eup %3076  ;;  %v1207_v4 = vadd.f32 1.0, %v3075_v53  ;;  %3094 = vpow2.f32 %v2154_v60  ;;  %2875 = vmatpush3.bf16.msra.mxu0 %v2872_v52 }
 0x4d4   :  { %v3079_v17 = vpop.eup %3078  ;;  %v1210_v14 = vadd.f32 1.0, %v3077_v10  ;;  %3096 = vpow2.f32 %v2153_v7 }
 0x4d5   :  { %v3081_v12 = vpop.eup %3080  ;;  %3098 = vrcp.f32 %v1207_v4  ;;  %1274 = vperm.xlu1 %2983, %v3079_v17  }
 0x4d6   :  { %v3083_v40 = vpop.eup %3082  ;;  %3100 = vrcp.f32 %v1210_v14  ;;  %2637 = vmatmul.mubr.f32.vlgmr.msra.gmra.mrb[32].mxu0 %v3624_v0  ;;  %1269 = vperm.xlu0 %2982, %v3081_v12  }
 0x4d7   :  { %v3085_v36 = vpop.eup %3084  ;;  %v1209_v13 = vadd.f32 1.0, %v3083_v40  ;;  %2639 = vmatprep.mubr.f32.mxu0 %v3626_v2 }
 0x4d8   :  { %v3087_v63 = vpop.eup %3086  ;;  %v1212_v26 = vadd.f32 1.0, %v3085_v36  ;;  %v990_v36 = vadd.f32 %v3754_v47, %v3561_v39 }
 0x4d9   :  { %v3089_v53 = vpop.eup %3088  ;;  %3102 = vrcp.f32 %v1209_v13  ;;  %1284 = vperm.xlu1 %2983, %v3087_v63  }
 0x4da   :  { %3104 = vrcp.f32 %v1212_v26  ;;  %v1211_v60 = vadd.f32 1.0, %v3089_v53  ;;  %2640 = vmatmul.mubr.f32.gmra.mrb[34].mxu0 %v3630_v6 }
 0x4db   :  { %v3091_v7 = vpop.eup %3090  ;;  %2642 = vmatprep.mubr.f32.mxu0 %v3632_v8 }
 0x4dc   :  { %v3093_v52 = vpop.eup %3092  ;;  %3106 = vrcp.f32 %v1211_v60  ;;  %1279 = vperm.xlu0 %2982, %v3091_v7  }
 0x4dd   :  { %v3095_v0 = vpop.eup %3094  ;;  %1294 = vperm.xlu1 %2983, %v3093_v52  }
 0x4de   :  { %v3097_v40 = vpop.eup %3096  ;;  %v1214_v10 = vadd.f32 1.0, %v3095_v0  ;;  %2643 = vmatmul.mubr.f32.gmra.mrb[36].mxu0 %v3636_v16 }
 0x4df   :  { %v3099_v2 = vpop.eup %3098  ;;  %v1213_v4 = vadd.f32 1.0, %v3097_v40  ;;  %2645 = vmatprep.mubr.f32.mxu0 %v3638_v18 }
 0x4e0   :  { %v3101_v17 = vpop.eup %3100  ;;  %3108 = vrcp.f32 %v1214_v10  ;;  %1289 = vperm.xlu0 %2982, %v3099_v2   ;;  %v4200_v2 = vld [vmem:[#allocation26_spill] sm:$0xff] }
 0x4e1   :  { %3110 = vrcp.f32 %v1213_v4  ;;  %1304 = vperm.xlu1 %2983, %v3101_v17   ;;  %v4201_v17 = vld [vmem:[#allocation29_spill] sm:$0xff] }
 0x4e2   :  { %2646 = vmatmul.mubr.f32.gmra.mrb[38].mxu0 %v3642_v25  ;;  %v972_v25 = vpop.permute.xlu1 %971 }
 0x4e3   :  { %v3103_v6 = vpop.eup %3102  ;;  %2648 = vmatprep.mubr.f32.mxu0 %v3644_v28  ;;  %v967_v28 = vpop.permute.xlu0 %966 }
 0x4e4   :  { %v3105_v8 = vpop.eup %3104  ;;  %1299 = vperm.xlu0 %2982, %v3103_v6  }
 0x4e5   :  { %1314 = vperm.xlu1 %2983, %v3105_v8  }
 0x4e6   :  { %v3107_v14 = vpop.eup %3106  ;;  %2649 = vmatmul.mubr.f32.gmra.mrb[40].mxu0 %v3648_v35 }
 0x4e7   :  { %2651 = vmatprep.mubr.f32.mxu0 %v3650_v38  ;;  %v991_v38 = vadd.f32 %v3751_v34, %v3555_v33  ;;  %v992_v33 = vadd.f32 %v3760_v50, %v3564_v41 }
 0x4e8   :  { %1309 = vperm.xlu0 %2982, %v3107_v14   ;;  %v4204_v14 = vld [vmem:[#allocation30_spill] sm:$0xff] }
 0x4ea   :  { %v3109_v16 = vpop.eup %3108  ;;  %2652 = vmatmul.mubr.f32.gmra.mrb[42].mxu0 %v3654_v45 }
 0x4eb   :  { %v3111_v18 = vpop.eup %3110  ;;  %1324 = vperm.xlu1 %2983, %v3109_v16   ;;  %2654 = vmatprep.mubr.f32.mxu0 %v3656_v51 }
 0x4ec   :  { %1319 = vperm.xlu0 %2982, %v3111_v18  }
 0x4ee   :  { %2655 = vmatmul.mubr.f32.gmra.mrb[44].mxu0 %v3660_v19 }
 0x4ef   :  { %2657 = vmatprep.mubr.f32.mxu0 %v3662_v20 }
 0x4f2   :  { %2658 = vmatmul.mubr.f32.gmra.mrb[46].mxu0 %v3666_v21  ;;  %v993_v21 = vadd.f32 %v3757_v56, %v3558_v37  ;;  %v994_v37 = vadd.f32 %v3763_v11, %v3567_v43 }
 0x54c   :  { %v1255_v35 = vpop.permute.xlu1 %1254 }
 0x54d   :  { %v1328_v12 = vmul.f32 %v3792_v44, %v1255_v35  ;;  %v1250_v45 = vpop.permute.xlu0 %1249 }
 0x54e   :  { %v1327_v51 = vmul.f32 %v1250_v45, %v3795_v1  ;;  %v995_v1 = vadd.f32 %v3766_v22, %v3570_v46  ;;  %v996_v22 = vadd.f32 %v3769_v49, %v3573_v48  ;;  %v1001_v48 = vadd.f32 %v3784_v62, %v3588_v3  ;;  %v4205_v3 = vld [vmem:[#allocation24_spill] sm:$0xff] }
 0x54f   :  { %v3877_v13 = vadd.f32 %v1328_v12, %v991_v38  ;;  %v989_v62 = vmul.f32 %v4205_v3, %v972_v25  ;;  %v4206_v38 = vld [vmem:[#allocation20_spill] sm:$0xff]  ;;  %v4207_v12 = vld [vmem:[#allocation27_spill] sm:$0xff] }
 0x550   :  { %v3879_v19 = vadd.f32 %v1327_v51, %v990_v36  ;;  %v1265_v20 = vpop.permute.xlu1 %1264  ;;  %v1002_v45 = vadd.f32 %v4207_v12, %v4206_v38  ;;  %v4208_v36 = vld [vmem:[#allocation25_spill] sm:$0xff] }
 0x551   :  { %v1330_v63 = vmul.f32 %v3800_v9, %v1265_v20  ;;  %v1260_v26 = vpop.permute.xlu0 %1259  ;;  %v988_v51 = vmul.f32 %v967_v28, %v4208_v36  ;;  %v4209_v20 = vld [vmem:[#allocation31_spill] sm:$0xff] }
 0x552   :  { %v1329_v34 = vmul.f32 %v1260_v26, %v3803_v59  ;;  %v997_v59 = vadd.f32 %v3772_v29, %v3576_v55  ;;  %v998_v29 = vadd.f32 %v3775_v31, %v3579_v57  ;;  %v4202_v57 = vld [vmem:[#allocation21_spill] sm:$0xff]  ;;  %v4203_v31 = vld [vmem:[#allocation28_spill] sm:$0xff] }
 0x553   :  { %v3887_v44 = vadd.f32 %v1330_v63, %v993_v21 }
 0x554   :  { %v3889_v39 = vadd.f32 %v1329_v34, %v992_v33  ;;  %v1275_v47 = vpop.permute.xlu1 %1274  ;;  %v4210_v33 = vld [vmem:[#allocation23_spill] sm:$0xff] }
 0x555   :  { %v1332_v53 = vmul.f32 %v3808_v24, %v1275_v47  ;;  %v1270_v60 = vpop.permute.xlu0 %1269  ;;  %v999_v24 = vadd.f32 %v3778_v42, %v3582_v61  ;;  %v1005_v34 = vadd.f32 %v989_v62, %v4210_v33 }
 0x556   :  { %v1331_v56 = vmul.f32 %v1270_v60, %v3811_v23 }
 0x557   :  { %v3897_v9 = vadd.f32 %v1332_v53, %v995_v1  ;;  %v4211_v53 = vld [vmem:[#allocation22_spill] sm:$0xff] }
 0x558   :  { %v3899_v41 = vadd.f32 %v1331_v56, %v994_v37  ;;  %v1285_v50 = vpop.permute.xlu1 %1284  ;;  %v1004_v25 = vadd.f32 %v988_v51, %v4211_v53 }
 0x559   :  { %v1334_v7 = vmul.f32 %v3816_v27, %v1285_v50 }
 0x55b   :  { %v3904_v52 = vadd.f32 %v1334_v7, %v997_v59  ;;  %v1280_v46 = vpop.permute.xlu0 %1279 }
 0x55c   :  { %v1333_v43 = vmul.f32 %v1280_v46, %v3819_v32  ;;  %v1295_v11 = vpop.permute.xlu1 %1294 }
 0x55d   :  { %v1336_v23 = vmul.f32 %v3824_v15, %v1295_v11  ;;  %v4199_v15 = vld [vmem:[#allocation19_spill] sm:$0xff] }
 0x55e   :  { %v3912_v0 = vadd.f32 %v1333_v43, %v996_v22  ;;  %v1000_v4 = vadd.f32 %v4200_v2, %v4199_v15 }
 0x55f   :  { %v3914_v40 = vadd.f32 %v1336_v23, %v999_v24  ;;  %v1290_v55 = vpop.permute.xlu0 %1289 }
 0x560   :  { %v1335_v27 = vmul.f32 %v1290_v55, %v3827_v30  ;;  %v1305_v10 = vpop.permute.xlu1 %1304  ;;  %v1003_v30 = vadd.f32 %v4203_v31, %v4202_v57 }
 0x561   :  { %v1338_v49 = vmul.f32 %v3832_v5, %v1305_v10 }
 0x562   :  { %v3922_v32 = vadd.f32 %v1335_v27, %v998_v29 }
 0x563   :  { %v3924_v61 = vadd.f32 %v1338_v49, %v1001_v48  ;;  %v1300_v42 = vpop.permute.xlu0 %1299 }
 0x564   :  { %v1337_v6 = vmul.f32 %v1300_v42, %v4201_v17  ;;  %v1315_v8 = vpop.permute.xlu1 %1314 }
 0x565   :  { %v1340_v16 = vmul.f32 %v4204_v14, %v1315_v8 }
 0x566   :  { %v3932_v18 = vadd.f32 %v1337_v6, %v1000_v4 }
 0x567   :  { %v3935_v5 = vadd.f32 %v1340_v16, %v1003_v30  ;;  %v1310_v35 = vpop.permute.xlu0 %1309 }
 0x568   :  { %v1339_v21 = vmul.f32 %v1310_v35, %v4209_v20 }
 0x56a   :  { %v3941_v63 = vadd.f32 %v1339_v21, %v1002_v45  ;;  %v1325_v26 = vpop.permute.xlu1 %1324 }
 0x56b   :  { %v1342_v47 = vmul.f32 %v3848_v58, %v1325_v26  ;;  %v1320_v1 = vpop.permute.xlu0 %1319 }
 0x56c   :  { %v1341_v60 = vmul.f32 %v1320_v1, %v3851_v54 }
 0x56d   :  { %v3947_v37 = vadd.f32 %v1342_v47, %v1005_v34 }
 0x56e   :  { %v3949_v56 = vadd.f32 %v1341_v60, %v1004_v25 }
 0x5a9   :  { %v3951_v50 = vpop.f32.mrb[32].mxu0 }
 0x5aa   :  { %v2156_v28 = vmul.f32 -1.442695, %v3951_v50  ;;  %v3954_v59 = vpop.f32.mrb[33].mxu0 }
 0x5ab   :  { %v2155_v7 = vmul.f32 -1.442695, %v3954_v59  ;;  %v2876_v58 = vpack.c.bf16 %v3951_v50, %v3954_v59 }
 0x5ac   :  { %3112 = vpow2.f32 %v2156_v28 }
 0x5ad   :  { %3114 = vpow2.f32 %v2155_v7  ;;  %v3959_v46 = vpop.f32.mrb[34].mxu0  ;;  %2877 = vmatprep.subr.bf16.mxu1 %v2876_v58 }
 0x5ae   :  { %v2158_v54 = vmul.f32 -1.442695, %v3959_v46  ;;  %v3962_v22 = vpop.f32.mrb[35].mxu0  ;;  %2879 = vmatpush3.bf16.msra.mxu1 %v2876_v58 }
 0x5af   :  { %v2157_v43 = vmul.f32 -1.442695, %v3962_v22  ;;  %v2880_v11 = vpack.c.bf16 %v3959_v46, %v3962_v22 }
 0x5b0   :  { %3116 = vpow2.f32 %v2158_v54 }
 0x5b1   :  { %3118 = vpow2.f32 %v2157_v43  ;;  %v3967_v24 = vpop.f32.mrb[36].mxu0  ;;  %2881 = vmatprep.subr.bf16.mxu1 %v2880_v11 }
 0x5b2   :  { %v2160_v23 = vmul.f32 -1.442695, %v3967_v24  ;;  %v3970_v55 = vpop.f32.mrb[37].mxu0  ;;  %2883 = vmatpush3.bf16.msra.mxu1 %v2880_v11 }
 0x5b3   :  { %v2159_v29 = vmul.f32 -1.442695, %v3970_v55  ;;  %v2884_v27 = vpack.c.bf16 %v3967_v24, %v3970_v55 }
 0x5b4   :  { %3120 = vpow2.f32 %v2160_v23 }
 0x5b5   :  { %3122 = vpow2.f32 %v2159_v29  ;;  %v3975_v10 = vpop.f32.mrb[38].mxu0  ;;  %2885 = vmatprep.subr.bf16.mxu1 %v2884_v27 }
 0x5b6   :  { %v3113_v48 = vpop.eup %3112  ;;  %v2162_v49 = vmul.f32 -1.442695, %v3975_v10  ;;  %v3978_v42 = vpop.f32.mrb[39].mxu0  ;;  %2887 = vmatpush3.bf16.msra.mxu1 %v2884_v27 }
 0x5b7   :  { %v3115_v15 = vpop.eup %3114  ;;  %v1553_v2 = vadd.f32 1.0, %v3113_v48  ;;  %v2161_v4 = vmul.f32 -1.442695, %v3978_v42  ;;  %v2888_v17 = vpack.c.bf16 %v3975_v10, %v3978_v42 }
 0x5b8   :  { %v1552_v6 = vadd.f32 1.0, %v3115_v15  ;;  %3124 = vpow2.f32 %v2162_v49 }
 0x5b9   :  { %3126 = vrcp.f32 %v1553_v2  ;;  %v3983_v8 = vpop.f32.mrb[40].mxu0  ;;  %2889 = vmatprep.subr.bf16.mxu1 %v2888_v17 }
 0x5ba   :  { %v3117_v57 = vpop.eup %3116  ;;  %3128 = vrcp.f32 %v1552_v6  ;;  %v2164_v31 = vmul.f32 -1.442695, %v3983_v8  ;;  %v3986_v30 = vpop.f32.mrb[41].mxu0  ;;  %2891 = vmatpush3.bf16.msra.mxu1 %v2888_v17 }
 0x5bb   :  { %v3119_v14 = vpop.eup %3118  ;;  %v1555_v16 = vadd.f32 1.0, %v3117_v57  ;;  %3130 = vpow2.f32 %v2161_v4  ;;  %v2163_v3 = vmul.f32 -1.442695, %v3986_v30  ;;  %v2892_v62 = vpack.c.bf16 %v3983_v8, %v3986_v30 }
 0x5bc   :  { %v1554_v35 = vadd.f32 1.0, %v3119_v14  ;;  %3132 = vpow2.f32 %v2164_v31 }
 0x5bd   :  { %3134 = vrcp.f32 %v1555_v16  ;;  %v3991_v38 = vpop.f32.mrb[42].mxu0  ;;  %2893 = vmatprep.subr.bf16.mxu1 %v2892_v62 }
 0x5be   :  { %v3121_v12 = vpop.eup %3120  ;;  %3136 = vrcp.f32 %v1554_v35  ;;  %v2166_v45 = vmul.f32 -1.442695, %v3991_v38  ;;  %v3994_v36 = vpop.f32.mrb[43].mxu0  ;;  %2895 = vmatpush3.bf16.msra.mxu1 %v2892_v62  ;;  %v3240_v62 = vld [vmem:[#allocation2 + $0x8] sm:$0xff] }
 0x5bf   :  { %v3123_v51 = vpop.eup %3122  ;;  %v1557_v20 = vadd.f32 1.0, %v3121_v12  ;;  %3138 = vpow2.f32 %v2163_v3  ;;  %v2165_v21 = vmul.f32 -1.442695, %v3994_v36  ;;  %v2896_v26 = vpack.c.bf16 %v3991_v38, %v3994_v36 }
 0x5c0   :  { %v1556_v33 = vadd.f32 1.0, %v3123_v51  ;;  %3140 = vpow2.f32 %v2166_v45  ;;  %v3241_v45 = vld [vmem:[#allocation2 + $0x10] sm:$0xff] }
 0x5c1   :  { %3142 = vrcp.f32 %v1557_v20  ;;  %v3999_v34 = vpop.f32.mrb[44].mxu0  ;;  %2897 = vmatprep.subr.bf16.mxu1 %v2896_v26 }
 0x5c2   :  { %v3125_v47 = vpop.eup %3124  ;;  %3144 = vrcp.f32 %v1556_v33  ;;  %v2168_v1 = vmul.f32 -1.442695, %v3999_v34  ;;  %v4002_v53 = vpop.f32.mrb[45].mxu0  ;;  %2899 = vmatpush3.bf16.msra.mxu1 %v2896_v26  ;;  %v3242_v33 = vld [vmem:[#allocation2 + $0x18] sm:$0xff] }
 0x5c3   :  { %v3127_v25 = vpop.eup %3126  ;;  %v1559_v60 = vadd.f32 1.0, %v3125_v47  ;;  %3146 = vpow2.f32 %v2165_v21  ;;  %v2167_v28 = vmul.f32 -1.442695, %v4002_v53  ;;  %v2900_v7 = vpack.c.bf16 %v3999_v34, %v4002_v53 }
 0x5c4   :  { %v3129_v58 = vpop.eup %3128  ;;  %3148 = vpow2.f32 %v2168_v1  ;;  %1607 = vperm.xlu1 %2983, %v3127_v25   ;;  %v3243_v1 = vld [vmem:[#allocation2 + $0x20] sm:$0xff] }
 0x5c5   :  { %v3131_v54 = vpop.eup %3130  ;;  %3150 = vrcp.f32 %v1559_v60  ;;  %v4007_v43 = vpop.f32.mrb[46].mxu0  ;;  %2901 = vmatprep.subr.bf16.mxu1 %v2900_v7  ;;  %1602 = vperm.xlu0 %2982, %v3129_v58   ;;  %v3244_v58 = vld [vmem:[#allocation2 + $0x28] sm:$0xff] }
 0x5c6   :  { %v3133_v11 = vpop.eup %3132  ;;  %v1558_v23 = vadd.f32 1.0, %v3131_v54  ;;  %3152 = vpow2.f32 %v2167_v28  ;;  %v2170_v29 = vmul.f32 -1.442695, %v4007_v43  ;;  %v4010_v27 = vpop.f32.mrb[47].mxu0  ;;  %2903 = vmatpush3.bf16.msra.mxu1 %v2900_v7 }
 0x5c7   :  { %v3135_v48 = vpop.eup %3134  ;;  %v1561_v49 = vadd.f32 1.0, %v3133_v11  ;;  %v2169_v15 = vmul.f32 -1.442695, %v4010_v27  ;;  %v2904_v2 = vpack.c.bf16 %v4007_v43, %v4010_v27 }
 0x5c8   :  { %v3137_v4 = vpop.eup %3136  ;;  %3154 = vrcp.f32 %v1558_v23  ;;  %1617 = vperm.xlu1 %2983, %v3135_v48   ;;  %v3245_v23 = vld [vmem:[#allocation2 + $0x30] sm:$0xff]  ;;  %v3246_v48 = vld [vmem:[#allocation2 + $0x38] sm:$0xff] }
 0x5c9   :  { %v3139_v17 = vpop.eup %3138  ;;  %3156 = vrcp.f32 %v1561_v49  ;;  %2905 = vmatprep.subr.bf16.mxu1 %v2904_v2  ;;  %1612 = vperm.xlu0 %2982, %v3137_v4  }
 0x5ca   :  { %v3141_v6 = vpop.eup %3140  ;;  %v1560_v57 = vadd.f32 1.0, %v3139_v17  ;;  %3158 = vpow2.f32 %v2170_v29  ;;  %2907 = vmatpush3.bf16.msra.mxu1 %v2904_v2  ;;  %v3248_v17 = vld [vmem:[#allocation2 + $0x48] sm:$0xff] }
 0x5cb   :  { %v3143_v31 = vpop.eup %3142  ;;  %v1563_v14 = vadd.f32 1.0, %v3141_v6  ;;  %3160 = vpow2.f32 %v2169_v15  ;;  %v3247_v15 = vld [vmem:[#allocation2 + $0x40] sm:$0xff]  ;;  %v3249_v6 = vld [vmem:[#allocation2 + $0x50] sm:$0xff] }
 0x5cc   :  { %v3145_v16 = vpop.eup %3144  ;;  %3162 = vrcp.f32 %v1560_v57  ;;  %1627 = vperm.xlu1 %2983, %v3143_v31   ;;  %v3250_v31 = vld [vmem:[#allocation2 + $0x58] sm:$0xff] }
 0x5cd   :  { %v3147_v3 = vpop.eup %3146  ;;  %3164 = vrcp.f32 %v1563_v14  ;;  %2693 = vmatmul.mubr.f32.vlgmr.msra.gmra.mrb[32].mxu1 %v3240_v62  ;;  %1622 = vperm.xlu0 %2982, %v3145_v16   ;;  %v3251_v16 = vld [vmem:[#allocation2 + $0x60] sm:$0xff]  ;;  %v3253_v62 = vld [vmem:[#allocation2 + $0x70] sm:$0xff] }
 0x5ce   :  { %v3149_v35 = vpop.eup %3148  ;;  %v1562_v12 = vadd.f32 1.0, %v3147_v3  ;;  %2695 = vmatprep.mubr.f32.mxu1 %v3241_v45  ;;  %v3252_v3 = vld [vmem:[#allocation2 + $0x68] sm:$0xff] }
 0x5cf   :  { %v3151_v51 = vpop.eup %3150  ;;  %v1565_v20 = vadd.f32 1.0, %v3149_v35  ;;  %v3254_v35 = vld [vmem:[#allocation2 + $0x78] sm:$0xff] }
 0x5d0   :  { %v3153_v21 = vpop.eup %3152  ;;  %3166 = vrcp.f32 %v1562_v12  ;;  %1637 = vperm.xlu1 %2983, %v3151_v51  }
 0x5d1   :  { %3168 = vrcp.f32 %v1565_v20  ;;  %v1564_v26 = vadd.f32 1.0, %v3153_v21  ;;  %2696 = vmatmul.mubr.f32.gmra.mrb[34].mxu1 %v3242_v33 }
 0x5d2   :  { %v3155_v47 = vpop.eup %3154  ;;  %2698 = vmatprep.mubr.f32.mxu1 %v3243_v1 }
 0x5d3   :  { %v3157_v25 = vpop.eup %3156  ;;  %3170 = vrcp.f32 %v1564_v26  ;;  %1632 = vperm.xlu0 %2982, %v3155_v47  }
 0x5d4   :  { %v3159_v60 = vpop.eup %3158  ;;  %1647 = vperm.xlu1 %2983, %v3157_v25  }
 0x5d5   :  { %v3161_v28 = vpop.eup %3160  ;;  %v1567_v7 = vadd.f32 1.0, %v3159_v60  ;;  %2699 = vmatmul.mubr.f32.gmra.mrb[36].mxu1 %v3244_v58 }
 0x5d6   :  { %v3163_v54 = vpop.eup %3162  ;;  %v1566_v11 = vadd.f32 1.0, %v3161_v28  ;;  %2701 = vmatprep.mubr.f32.mxu1 %v3245_v23 }
 0x5d7   :  { %v3165_v29 = vpop.eup %3164  ;;  %3172 = vrcp.f32 %v1567_v7  ;;  %1642 = vperm.xlu0 %2982, %v3163_v54  }
 0x5d8   :  { %3174 = vrcp.f32 %v1566_v11  ;;  %1657 = vperm.xlu1 %2983, %v3165_v29  }
 0x5d9   :  { %2702 = vmatmul.mubr.f32.gmra.mrb[38].mxu1 %v3246_v48 }
 0x5da   :  { %v3167_v49 = vpop.eup %3166  ;;  %2704 = vmatprep.mubr.f32.mxu1 %v3247_v15 }
 0x5db   :  { %v3169_v2 = vpop.eup %3168  ;;  %1652 = vperm.xlu0 %2982, %v3167_v49  }
 0x5dc   :  { %1667 = vperm.xlu1 %2983, %v3169_v2  }
 0x5dd   :  { %v3171_v4 = vpop.eup %3170  ;;  %2705 = vmatmul.mubr.f32.gmra.mrb[40].mxu1 %v3248_v17 }
 0x5de   :  { %2707 = vmatprep.mubr.f32.mxu1 %v3249_v6 }
 0x5df   :  { %1662 = vperm.xlu0 %2982, %v3171_v4  }
 0x5e1   :  { %v3173_v57 = vpop.eup %3172  ;;  %2708 = vmatmul.mubr.f32.gmra.mrb[42].mxu1 %v3250_v31 }
 0x5e2   :  { %v3175_v14 = vpop.eup %3174  ;;  %1677 = vperm.xlu1 %2983, %v3173_v57   ;;  %2710 = vmatprep.mubr.f32.mxu1 %v3251_v16 }
 0x5e3   :  { %1672 = vperm.xlu0 %2982, %v3175_v14  }
 0x5e5   :  { %2711 = vmatmul.mubr.f32.gmra.mrb[44].mxu1 %v3252_v3 }
 0x5e6   :  { %2713 = vmatprep.mubr.f32.mxu1 %v3253_v62 }
 0x5e9   :  { %2714 = vmatmul.mubr.f32.gmra.mrb[46].mxu1 %v3254_v35 }
 0x643   :  { %v1608_v12 = vpop.permute.xlu1 %1607 }
 0x644   :  { %v1681_v45 = vmul.f32 %v3951_v50, %v1608_v12  ;;  %v1603_v51 = vpop.permute.xlu0 %1602 }
 0x645   :  { %v1680_v20 = vmul.f32 %v1603_v51, %v3954_v59 }
 0x646   :  { %v4018_v21 = vadd.f32 %v1681_v45, %v3877_v13 }
 0x647   :  { %v4021_v26 = vadd.f32 %v1680_v20, %v3879_v19  ;;  %v1618_v33 = vpop.permute.xlu1 %1617 }
 0x648   :  { %v1683_v47 = vmul.f32 %v3959_v46, %v1618_v33  ;;  %v1613_v1 = vpop.permute.xlu0 %1612 }
 0x649   :  { %v1682_v25 = vmul.f32 %v1613_v1, %v3962_v22 }
 0x64a   :  { %v4026_v60 = vadd.f32 %v1683_v47, %v3887_v44 }
 0x64b   :  { %v4029_v50 = vadd.f32 %v1682_v25, %v3889_v39  ;;  %v1628_v28 = vpop.permute.xlu1 %1627 }
 0x64c   :  { %v1685_v59 = vmul.f32 %v3967_v24, %v1628_v28  ;;  %v1623_v13 = vpop.permute.xlu0 %1622 }
 0x64d   :  { %v1684_v7 = vmul.f32 %v1623_v13, %v3970_v55 }
 0x64e   :  { %v4034_v19 = vadd.f32 %v1685_v59, %v3897_v9 }
 0x64f   :  { %v4037_v46 = vadd.f32 %v1684_v7, %v3899_v41  ;;  %v1638_v58 = vpop.permute.xlu1 %1637 }
 0x650   :  { %v1687_v22 = vmul.f32 %v3975_v10, %v1638_v58 }
 0x652   :  { %v4041_v44 = vadd.f32 %v1687_v22, %v3904_v52  ;;  %v1633_v39 = vpop.permute.xlu0 %1632 }
 0x653   :  { %v1686_v54 = vmul.f32 %v1633_v39, %v3978_v42  ;;  %v1648_v11 = vpop.permute.xlu1 %1647 }
 0x654   :  { %v1689_v24 = vmul.f32 %v3983_v8, %v1648_v11 }
 0x655   :  { %v4046_v55 = vadd.f32 %v1686_v54, %v3912_v0 }
 0x656   :  { %v4049_v9 = vadd.f32 %v1689_v24, %v3914_v40  ;;  %v1643_v41 = vpop.permute.xlu0 %1642 }
 0x657   :  { %v1688_v23 = vmul.f32 %v1643_v41, %v3986_v30  ;;  %v1658_v29 = vpop.permute.xlu1 %1657 }
 0x658   :  { %v1691_v10 = vmul.f32 %v3991_v38, %v1658_v29 }
 0x659   :  { %v4054_v52 = vadd.f32 %v1688_v23, %v3922_v32 }
 0x65a   :  { %v4057_v42 = vadd.f32 %v1691_v10, %v3924_v61  ;;  %v1653_v48 = vpop.permute.xlu0 %1652 }
 0x65b   :  { %v1690_v8 = vmul.f32 %v1653_v48, %v3994_v36  ;;  %v1668_v0 = vpop.permute.xlu1 %1667 }
 0x65c   :  { %v1693_v49 = vmul.f32 %v3999_v34, %v1668_v0 }
 0x65d   :  { %v4062_v40 = vadd.f32 %v1690_v8, %v3932_v18 }
 0x65e   :  { %v4065_v30 = vadd.f32 %v1693_v49, %v3935_v5  ;;  %v1663_v15 = vpop.permute.xlu0 %1662 }
 0x65f   :  { %v1692_v38 = vmul.f32 %v1663_v15, %v4002_v53 }
 0x661   :  { %v4069_v32 = vadd.f32 %v1692_v38, %v3941_v63  ;;  %v1678_v61 = vpop.permute.xlu1 %1677 }
 0x662   :  { %v1695_v2 = vmul.f32 %v4007_v43, %v1678_v61  ;;  %v1673_v4 = vpop.permute.xlu0 %1672 }
 0x663   :  { %v1694_v36 = vmul.f32 %v1673_v4, %v4010_v27 }
 0x664   :  { %v4074_v34 = vadd.f32 %v1695_v2, %v3947_v37 }
 0x665   :  { %v4077_v18 = vadd.f32 %v1694_v36, %v3949_v56 }
 0x6a0   :  { %v4079_v5 = vpop.f32.mrb[32].mxu1 }
 0x6a1   :  { %v2172_v17 = vmul.f32 -1.442695, %v4079_v5  ;;  %v4082_v53 = vpop.f32.mrb[33].mxu1 }
 0x6a2   :  { %v2171_v63 = vmul.f32 -1.442695, %v4082_v53 }
 0x6a3   :  { %3176 = vpow2.f32 %v2172_v17 }
 0x6a4   :  { %3178 = vpow2.f32 %v2171_v63  ;;  %v4085_v43 = vpop.f32.mrb[34].mxu1 }
 0x6a5   :  { %v2174_v27 = vmul.f32 -1.442695, %v4085_v43  ;;  %v4088_v6 = vpop.f32.mrb[35].mxu1 }
 0x6a6   :  { %v2173_v37 = vmul.f32 -1.442695, %v4088_v6 }
 0x6a7   :  { %3180 = vpow2.f32 %v2174_v27 }
 0x6a8   :  { %3182 = vpow2.f32 %v2173_v37  ;;  %v4091_v56 = vpop.f32.mrb[36].mxu1 }
 0x6a9   :  { %v2176_v57 = vmul.f32 -1.442695, %v4091_v56  ;;  %v4094_v31 = vpop.f32.mrb[37].mxu1 }
 0x6aa   :  { %v2175_v14 = vmul.f32 -1.442695, %v4094_v31 }
 0x6ab   :  { %3184 = vpow2.f32 %v2176_v57 }
 0x6ac   :  { %3186 = vpow2.f32 %v2175_v14  ;;  %v4097_v16 = vpop.f32.mrb[38].mxu1 }
 0x6ad   :  { %v3177_v3 = vpop.eup %3176  ;;  %v2178_v62 = vmul.f32 -1.442695, %v4097_v16  ;;  %v4100_v35 = vpop.f32.mrb[39].mxu1 }
 0x6ae   :  { %v3179_v12 = vpop.eup %3178  ;;  %v1906_v45 = vadd.f32 1.0, %v3177_v3  ;;  %v2177_v51 = vmul.f32 -1.442695, %v4100_v35 }
 0x6af   :  { %v1905_v20 = vadd.f32 1.0, %v3179_v12  ;;  %3188 = vpow2.f32 %v2178_v62 }
 0x6b0   :  { %3190 = vrcp.f32 %v1906_v45  ;;  %v4103_v33 = vpop.f32.mrb[40].mxu1 }
 0x6b1   :  { %v3181_v47 = vpop.eup %3180  ;;  %3192 = vrcp.f32 %v1905_v20  ;;  %v2180_v1 = vmul.f32 -1.442695, %v4103_v33  ;;  %v4106_v25 = vpop.f32.mrb[41].mxu1 }
 0x6b2   :  { %v3183_v28 = vpop.eup %3182  ;;  %v1908_v59 = vadd.f32 1.0, %v3181_v47  ;;  %3194 = vpow2.f32 %v2177_v51  ;;  %v2179_v13 = vmul.f32 -1.442695, %v4106_v25 }
 0x6b3   :  { %v1907_v7 = vadd.f32 1.0, %v3183_v28  ;;  %3196 = vpow2.f32 %v2180_v1 }
 0x6b4   :  { %3198 = vrcp.f32 %v1908_v59  ;;  %v4109_v58 = vpop.f32.mrb[42].mxu1 }
 0x6b5   :  { %v3185_v22 = vpop.eup %3184  ;;  %3200 = vrcp.f32 %v1907_v7  ;;  %v2182_v39 = vmul.f32 -1.442695, %v4109_v58  ;;  %v4112_v54 = vpop.f32.mrb[43].mxu1 }
 0x6b6   :  { %v3187_v11 = vpop.eup %3186  ;;  %v1910_v24 = vadd.f32 1.0, %v3185_v22  ;;  %3202 = vpow2.f32 %v2179_v13  ;;  %v2181_v41 = vmul.f32 -1.442695, %v4112_v54 }
 0x6b7   :  { %v1909_v23 = vadd.f32 1.0, %v3187_v11  ;;  %3204 = vpow2.f32 %v2182_v39 }
 0x6b8   :  { %3206 = vrcp.f32 %v1910_v24  ;;  %v4115_v29 = vpop.f32.mrb[44].mxu1 }
 0x6b9   :  { %v3189_v10 = vpop.eup %3188  ;;  %3208 = vrcp.f32 %v1909_v23  ;;  %v2184_v48 = vmul.f32 -1.442695, %v4115_v29  ;;  %v4118_v8 = vpop.f32.mrb[45].mxu1 }
 0x6ba   :  { %v3191_v0 = vpop.eup %3190  ;;  %v1912_v49 = vadd.f32 1.0, %v3189_v10  ;;  %3210 = vpow2.f32 %v2181_v41  ;;  %v2183_v15 = vmul.f32 -1.442695, %v4118_v8 }
 0x6bb   :  { %v3193_v38 = vpop.eup %3192  ;;  %3212 = vpow2.f32 %v2184_v48  ;;  %1960 = vperm.xlu1 %2983, %v3191_v0  }
 0x6bc   :  { %v3195_v61 = vpop.eup %3194  ;;  %3214 = vrcp.f32 %v1912_v49  ;;  %v4121_v2 = vpop.f32.mrb[46].mxu1  ;;  %1955 = vperm.xlu0 %2982, %v3193_v38  }
 0x6bd   :  { %v3197_v4 = vpop.eup %3196  ;;  %v1911_v36 = vadd.f32 1.0, %v3195_v61  ;;  %3216 = vpow2.f32 %v2183_v15  ;;  %v2186_v17 = vmul.f32 -1.442695, %v4121_v2  ;;  %v4124_v63 = vpop.f32.mrb[47].mxu1 }
 0x6be   :  { %v3199_v27 = vpop.eup %3198  ;;  %v1914_v37 = vadd.f32 1.0, %v3197_v4  ;;  %v2185_v57 = vmul.f32 -1.442695, %v4124_v63 }
 0x6bf   :  { %v3201_v14 = vpop.eup %3200  ;;  %3218 = vrcp.f32 %v1911_v36  ;;  %1970 = vperm.xlu1 %2983, %v3199_v27  }
 0x6c0   :  { %v3203_v3 = vpop.eup %3202  ;;  %3220 = vrcp.f32 %v1914_v37  ;;  %1965 = vperm.xlu0 %2982, %v3201_v14  }
 0x6c1   :  { %v3205_v62 = vpop.eup %3204  ;;  %v1913_v12 = vadd.f32 1.0, %v3203_v3  ;;  %3222 = vpow2.f32 %v2186_v17 }
 0x6c2   :  { %v3207_v45 = vpop.eup %3206  ;;  %v1916_v51 = vadd.f32 1.0, %v3205_v62  ;;  %3224 = vpow2.f32 %v2185_v57 }
 0x6c3   :  { %v3209_v20 = vpop.eup %3208  ;;  %3226 = vrcp.f32 %v1913_v12  ;;  %1980 = vperm.xlu1 %2983, %v3207_v45  }
 0x6c4   :  { %v3211_v47 = vpop.eup %3210  ;;  %3228 = vrcp.f32 %v1916_v51  ;;  %1975 = vperm.xlu0 %2982, %v3209_v20  }
 0x6c5   :  { %v3213_v1 = vpop.eup %3212  ;;  %v1915_v28 = vadd.f32 1.0, %v3211_v47 }
 0x6c6   :  { %v3215_v59 = vpop.eup %3214  ;;  %v1918_v13 = vadd.f32 1.0, %v3213_v1 }
 0x6c7   :  { %v3217_v7 = vpop.eup %3216  ;;  %3230 = vrcp.f32 %v1915_v28  ;;  %1990 = vperm.xlu1 %2983, %v3215_v59  }
 0x6c8   :  { %3232 = vrcp.f32 %v1918_v13  ;;  %v1917_v22 = vadd.f32 1.0, %v3217_v7 }
 0x6c9   :  { %v3219_v39 = vpop.eup %3218 }
 0x6ca   :  { %v3221_v11 = vpop.eup %3220  ;;  %3234 = vrcp.f32 %v1917_v22  ;;  %1985 = vperm.xlu0 %2982, %v3219_v39  }
 0x6cb   :  { %v3223_v24 = vpop.eup %3222  ;;  %2000 = vperm.xlu1 %2983, %v3221_v11  }
 0x6cc   :  { %v3225_v41 = vpop.eup %3224  ;;  %v1920_v23 = vadd.f32 1.0, %v3223_v24 }
 0x6cd   :  { %v3227_v10 = vpop.eup %3226  ;;  %v1919_v48 = vadd.f32 1.0, %v3225_v41 }
 0x6ce   :  { %v3229_v0 = vpop.eup %3228  ;;  %3236 = vrcp.f32 %v1920_v23  ;;  %1995 = vperm.xlu0 %2982, %v3227_v10  }
 0x6cf   :  { %3238 = vrcp.f32 %v1919_v48  ;;  %2010 = vperm.xlu1 %2983, %v3229_v0  }
 0x6d1   :  { %v3231_v49 = vpop.eup %3230 }
 0x6d2   :  { %v3233_v15 = vpop.eup %3232  ;;  %2005 = vperm.xlu0 %2982, %v3231_v49  }
 0x6d3   :  { %2020 = vperm.xlu1 %2983, %v3233_v15  }
 0x6d4   :  { %v3235_v38 = vpop.eup %3234 }
 0x6d6   :  { %2015 = vperm.xlu0 %2982, %v3235_v38  }
 0x6d8   :  { %v3237_v61 = vpop.eup %3236 }
 0x6d9   :  { %v3239_v4 = vpop.eup %3238  ;;  %2030 = vperm.xlu1 %2983, %v3237_v61  }
 0x6da   :  { %2025 = vperm.xlu0 %2982, %v3239_v4  }
 0x73a   :  { %v1961_v36 = vpop.permute.xlu1 %1960 }
 0x73b   :  { %v2034_v17 = vmul.f32 %v4079_v5, %v1961_v36  ;;  %v1956_v27 = vpop.permute.xlu0 %1955 }
 0x73c   :  { %v2033_v37 = vmul.f32 %v1956_v27, %v4082_v53 }
 0x73d   :  { %v2050_v57 = vadd.f32 %v2034_v17, %v4018_v21 }
 0x73e   :  { %v2049_v14 = vadd.f32 %v2033_v37, %v4021_v26  ;;  %v1971_v3 = vpop.permute.xlu1 %1970 }
 0x73f   :  { %2066 = vst [vmem:[#allocation10 + $0x8] sm:$0xff] %v2050_v57  ;;  %v2036_v62 = vmul.f32 %v4085_v43, %v1971_v3  ;;  %v1966_v12 = vpop.permute.xlu0 %1965 }
 0x740   :  { %2065 = vst [vmem:[#allocation10] sm:$0xff] %v2049_v14  ;;  %v2035_v45 = vmul.f32 %v1966_v12, %v4088_v6 }
 0x741   :  { %v2052_v51 = vadd.f32 %v2036_v62, %v4026_v60 }
 0x742   :  { %v2051_v20 = vadd.f32 %v2035_v45, %v4029_v50  ;;  %v1981_v5 = vpop.permute.xlu1 %1980 }
 0x743   :  { %2068 = vst [vmem:[#allocation10 + $0x18] sm:$0xff] %v2052_v51  ;;  %v2038_v53 = vmul.f32 %v4091_v56, %v1981_v5  ;;  %v1976_v47 = vpop.permute.xlu0 %1975 }
 0x744   :  { %2067 = vst [vmem:[#allocation10 + $0x10] sm:$0xff] %v2051_v20  ;;  %v2037_v21 = vmul.f32 %v1976_v47, %v4094_v31 }
 0x745   :  { %v2054_v26 = vadd.f32 %v2038_v53, %v4034_v19 }
 0x746   :  { %v2053_v43 = vadd.f32 %v2037_v21, %v4037_v46  ;;  %v1991_v1 = vpop.permute.xlu1 %1990 }
 0x747   :  { %2070 = vst [vmem:[#allocation10 + $0x28] sm:$0xff] %v2054_v26  ;;  %v2040_v6 = vmul.f32 %v4097_v16, %v1991_v1 }
 0x748   :  { %2069 = vst [vmem:[#allocation10 + $0x20] sm:$0xff] %v2053_v43 }
 0x749   :  { %v2056_v60 = vadd.f32 %v2040_v6, %v4041_v44  ;;  %v1986_v50 = vpop.permute.xlu0 %1985 }
 0x74a   :  { %v2039_v28 = vmul.f32 %v1986_v50, %v4100_v35  ;;  %v2001_v59 = vpop.permute.xlu1 %2000 }
 0x74b   :  { %2072 = vst [vmem:[#allocation10 + $0x38] sm:$0xff] %v2056_v60  ;;  %v2042_v56 = vmul.f32 %v4103_v33, %v2001_v59 }
 0x74c   :  { %v2055_v31 = vadd.f32 %v2039_v28, %v4046_v55 }
 0x74d   :  { %v2058_v19 = vadd.f32 %v2042_v56, %v4049_v9  ;;  %v1996_v13 = vpop.permute.xlu0 %1995 }
 0x74e   :  { %2071 = vst [vmem:[#allocation10 + $0x30] sm:$0xff] %v2055_v31  ;;  %v2041_v46 = vmul.f32 %v1996_v13, %v4106_v25  ;;  %v2011_v7 = vpop.permute.xlu1 %2010 }
 0x74f   :  { %2074 = vst [vmem:[#allocation10 + $0x48] sm:$0xff] %v2058_v19  ;;  %v2044_v16 = vmul.f32 %v4109_v58, %v2011_v7 }
 0x750   :  { %v2057_v44 = vadd.f32 %v2041_v46, %v4054_v52 }
 0x751   :  { %v2060_v35 = vadd.f32 %v2044_v16, %v4057_v42  ;;  %v2006_v22 = vpop.permute.xlu0 %2005 }
 0x752   :  { %2073 = vst [vmem:[#allocation10 + $0x40] sm:$0xff] %v2057_v44  ;;  %v2043_v33 = vmul.f32 %v2006_v22, %v4112_v54  ;;  %v2021_v39 = vpop.permute.xlu1 %2020 }
 0x753   :  { %2076 = vst [vmem:[#allocation10 + $0x58] sm:$0xff] %v2060_v35  ;;  %v2046_v55 = vmul.f32 %v4115_v29, %v2021_v39 }
 0x754   :  { %v2059_v9 = vadd.f32 %v2043_v33, %v4062_v40 }
 0x755   :  { %v2062_v25 = vadd.f32 %v2046_v55, %v4065_v30  ;;  %v2016_v11 = vpop.permute.xlu0 %2015 }
 0x756   :  { %2075 = vst [vmem:[#allocation10 + $0x50] sm:$0xff] %v2059_v9  ;;  %v2045_v58 = vmul.f32 %v2016_v11, %v4118_v8 }
 0x757   :  { %2078 = vst [vmem:[#allocation10 + $0x68] sm:$0xff] %v2062_v25 }
 0x758   :  { %v2061_v52 = vadd.f32 %v2045_v58, %v4069_v32  ;;  %v2031_v42 = vpop.permute.xlu1 %2030 }
 0x759   :  { %v2048_v24 = vmul.f32 %v4121_v2, %v2031_v42  ;;  %v2026_v41 = vpop.permute.xlu0 %2025 }
 0x75a   :  { %2077 = vst [vmem:[#allocation10 + $0x60] sm:$0xff] %v2061_v52  ;;  %v2047_v54 = vmul.f32 %v2026_v41, %v4124_v63 }
 0x75b   :  { %v2064_v40 = vadd.f32 %v2048_v24, %v4074_v34 }
 0x75c   :  { %v2063_v30 = vadd.f32 %v2047_v54, %v4077_v18 }
 0x75d   :  { %2080 = vst [vmem:[#allocation10 + $0x78] sm:$0xff] %v2064_v40 }
 0x75e   :  { %2079 = vst [vmem:[#allocation10 + $0x70] sm:$0xff] %v2063_v30 }
 0x75f   :  { %3354 = shalt.err (!%p3351_p8)
}
 0x760   :  { %s3355_s28 = scalar_lea.hbm %s4180_s6, 2048 }
 0x761   :  { %p3356_p9 = scmp.ne.s32.totalorder %s4180_s6, %s3355_s28  ;;  %p3359_p10 = scmp.lt.u32.totalorder %s3355_s28, %s4180_s6 }
 0x763   :  { %p3361_p11 = pnand %p3359_p10, %p3356_p9 }
 0x765   :  { %3364 = shalt.err (!%p3361_p11)
}
 0x766   :  { %2092 = dma.vmem_to_hbm [thread:$0]  %s2087_s23, 2048, %s4180_s6, [#allocation6], %s3375_s9, %s3375_s9, %s3376_s10  }
 0x767   :  { %3371 = dma.done.wait [#allocation6], 2048  }
 0x768   :  { %3372 = vsyncadd [#allocation6], 4294965248 }
 0x769   :  { %2096 = vsyncpa [#allocation5], 1 }
 0x76a   :  { %2097 = vsyncpa [#allocation8], 1 }
 0x76b   :  { %2098 = vsyncpa [#allocation6], 1 }
 0x76c   :  { %2099 = vsyncmov [#allocation3] }
 0x76f   :  { %s2100_s3 = vpop.sfrf %2099 }
 0x770   :  { %p2187_p12 = scmp.ne.s32.totalorder %s2100_s3, 0 }
 0x772   :  { %2104 = shalt.err (%p2187_p12)  }

</bundles_post_ra>
